<compile_context>
chip_gen: v7x
topology: tpu7x:2x2x1
jax: 0.10.0
libtpu: 0.0.40
codegen_flags: <defaults>
</compile_context>

<pallas_src>
import functools

import jax
import jax.numpy as jnp
from jax.experimental import pallas as pl
from jax.experimental.pallas import tpu as pltpu


def _round_up(x, m):
    return ((x + m - 1) // m) * m


# --------------------------------------------------------------------------- #
# Kernel
# --------------------------------------------------------------------------- #
def _mfa_kernel(metric_ref, log_ref,
                wm_cat_ref, bm_cat_ref, wl_cat_ref, bl_cat_ref,
                wmvec_ref, wlvec_ref,
                mlp_w1_ref, mlp_b1_ref, mlp_w2_ref, mlp_b2_ref,
                out_ref):
    f32 = jnp.float32
    m3 = metric_ref[...]                     # (BB, N, H)
    l3 = log_ref[...]                        # (BB, N, H)
    bb, n, h = m3.shape
    hp = wmvec_ref.shape[-1]                 # 128-aligned per-block lane width
    rec_w = mlp_w2_ref.shape[-1]             # padded rec_metric|rec_log width
    n_pad = out_ref.shape[-1] - 2 * hp - rec_w   # padded sim width

    # ---- Fused projections: one wide MXU matmul per side over ALL instances
    # in the block (rows = BB*N).  Blocks inside the wide matrices are padded
    # to 128 lanes so all downstream slices are vreg-aligned.
    m2 = m3.reshape(bb * n, h)
    l2 = l3.reshape(bb * n, h)
    mcat = jnp.dot(m2, wm_cat_ref[...], preferred_element_type=f32) + bm_cat_ref[...]
    lcat = jnp.dot(l2, wl_cat_ref[...], preferred_element_type=f32) + bl_cat_ref[...]

    mw      = mcat[:, 0:h].reshape(bb, n, h)              # m @ W_sim
    wm_pre  = mcat[:, hp:2 * hp].reshape(bb, n, hp)       # W_metric(m)   (pad lanes = 0)
    wm2     = mcat[:, 2 * hp:3 * hp].reshape(bb, n, hp)   # W_metric_2(m)
    lws     = lcat[:, 0:h].reshape(bb, n, h)              # l @ W_sim^T
    wl_l    = lcat[:, hp:2 * hp].reshape(bb, n, hp)       # W_log(l)
    wl2_pre = lcat[:, 2 * hp:3 * hp].reshape(bb, n, hp)   # W_log_2(l)

    # ---- Eq. 9: similarity = tanh(M W_sim L^T), per instance (A @ B^T form).
    sim = jnp.tanh(jnp.einsum('bnh,bmh->bnm', mw, l3,
                              preferred_element_type=f32))        # (BB, N, N)
    # sim^T computed directly (independent MXU chain, no transpose op).
    sim_t = jnp.tanh(jnp.einsum('bnh,bmh->bnm', lws, m3,
                                preferred_element_type=f32))      # (BB, N, N)

    # ---- Eq. 10: attention weights.
    z_m = jnp.tanh(wm_pre + jnp.einsum('bnm,bmh->bnh', sim, wl_l,
                                       preferred_element_type=f32))
    z_l = jnp.tanh(wl2_pre + jnp.einsum('bnm,bmh->bnh', sim_t, wm2,
                                        preferred_element_type=f32))

    # Score dot-products: VPU multiply + lane reduce (w vectors are (1, Hp),
    # zero in the pad lanes so padded columns contribute nothing).
    s_m = jnp.sum(z_m * wmvec_ref[...], axis=-1, keepdims=True)   # (BB, N, 1)
    s_l = jnp.sum(z_l * wlvec_ref[...], axis=-1, keepdims=True)

    # Softmax over the entity axis (exact division for parity with torch).
    e_m = jnp.exp(s_m - jnp.max(s_m, axis=1, keepdims=True))
    a_m = e_m / jnp.sum(e_m, axis=1, keepdims=True)
    e_l = jnp.exp(s_l - jnp.max(s_l, axis=1, keepdims=True))
    a_l = e_l / jnp.sum(e_l, axis=1, keepdims=True)

    weighted_m = m3 * a_m                    # (BB, N, H)
    weighted_l = l3 * a_l

    # ---- Fused block-diagonal MLPs (Linear -> ReLU -> Dropout(id) -> Linear).
    # Input slab [weighted_m | 0 | weighted_l | 0] places each piece at a
    # 128-aligned lane offset; it doubles as the first part of the output.
    pad_w = hp - h
    if pad_w:
        zpad = jnp.zeros((bb, n, pad_w), f32)
        wcat = jnp.concatenate([weighted_m, zpad, weighted_l, zpad], axis=-1)
    else:
        wcat = jnp.concatenate([weighted_m, weighted_l], axis=-1)   # (BB, N, 2Hp)
    wcat2 = wcat.reshape(bb * n, 2 * hp)

    h1 = jnp.maximum(
        jnp.dot(wcat2, mlp_w1_ref[...], preferred_element_type=f32) + mlp_b1_ref[...],
        0.0)
    rec = jnp.dot(h1, mlp_w2_ref[...], preferred_element_type=f32) + mlp_b2_ref[...]
    rec = rec.reshape(bb, n, rec_w)          # [rec_metric | pad | rec_log | pad]

    # ---- Packed, fully 128-aligned output slab; single unmasked store.
    if n_pad > n:
        sim_out = jnp.concatenate([sim, jnp.zeros((bb, n, n_pad - n), f32)], axis=-1)
    else:
        sim_out = sim
    out_ref[...] = jnp.concatenate([wcat, sim_out, rec], axis=-1)


# --------------------------------------------------------------------------- #
# One-time parameter fusion (hoisted out of the per-call path)
# --------------------------------------------------------------------------- #
def prepare_params(params, n_metrics, n_logs):
    f32 = jnp.float32
    H = params["W_sim"].shape[0]
    Hp = _round_up(H, 128)

    def pad_cols(w, width):
        return jnp.pad(w.astype(f32), ((0, 0), (0, width - w.shape[1])))

    # Fused projections: m @ [W_sim | W_metric | W_metric_2],
    #                    l @ [W_sim^T | W_log | W_log_2]; each block 128-aligned.
    wm_cat = jnp.concatenate([pad_cols(params["W_sim"], Hp),
                              pad_cols(params["Wm_w"], Hp),
                              pad_cols(params["Wm2_w"], Hp)], axis=1)
    bm_cat = jnp.concatenate([jnp.zeros((1, Hp), f32),
                              pad_cols(params["Wm_b"], Hp),
                              pad_cols(params["Wm2_b"], Hp)], axis=1)
    wl_cat = jnp.concatenate([pad_cols(params["W_sim"].T, Hp),
                              pad_cols(params["Wl_w"], Hp),
                              pad_cols(params["Wl2_w"], Hp)], axis=1)
    bl_cat = jnp.concatenate([jnp.zeros((1, Hp), f32),
                              pad_cols(params["Wl_b"], Hp),
                              pad_cols(params["Wl2_b"], Hp)], axis=1)

    w_metric = pad_cols(params["w_metric"], Hp)          # (1, Hp)
    w_log = pad_cols(params["w_log"], Hp)

    # Block-diagonal MLP layer 1: [wm | pad | wl | pad] (2Hp) -> [h_m | h_l] (4H)
    Dh = 4 * H
    w1 = jnp.zeros((2 * Hp, Dh), f32)
    w1 = w1.at[0:H, 0:2 * H].set(params["mm_w1"])
    w1 = w1.at[Hp:Hp + H, 2 * H:4 * H].set(params["ml_w1"])
    b1 = jnp.concatenate([params["mm_b1"], params["ml_b1"]], axis=1)   # (1, 4H)

    # Block-diagonal MLP layer 2 with 128-aligned output block boundaries.
    rm_w, rl_w = n_metrics * H, n_logs * H
    rm_p, rl_p = _round_up(rm_w, 128), _round_up(rl_w, 128)
    w2 = jnp.zeros((Dh, rm_p + rl_p), f32)
    w2 = w2.at[0:2 * H, 0:rm_w].set(params["mm_w2"])
    w2 = w2.at[2 * H:4 * H, rm_p:rm_p + rl_w].set(params["ml_w2"])
    b2 = jnp.zeros((1, rm_p + rl_p), f32)
    b2 = b2.at[:, 0:rm_w].set(params["mm_b2"])
    b2 = b2.at[:, rm_p:rm_p + rl_w].set(params["ml_b2"])

    return {"wm_cat": wm_cat, "bm_cat": bm_cat, "wl_cat": wl_cat, "bl_cat": bl_cat,
            "w_metric": w_metric, "w_log": w_log,
            "mlp_w1": w1, "mlp_b1": b1, "mlp_w2": w2, "mlp_b2": b2}


# --------------------------------------------------------------------------- #
# Wrapper
# --------------------------------------------------------------------------- #
def multi_factor_attention(metric_repr, log_repr, prepared, *,
                           n_metrics, n_logs, block_batch=8):
    """Accepts (N, H) (module-equivalent) or (B, N, H) batched inputs."""
    unbatched = metric_repr.ndim == 2
    if unbatched:
        metric_repr, log_repr = metric_repr[None], log_repr[None]

    B, N, H = metric_repr.shape
    Hp = prepared["w_metric"].shape[-1]
    Np = _round_up(N, 128)
    rm_w, rl_w = n_metrics * H, n_logs * H
    rm_p, rl_p = _round_up(rm_w, 128), _round_up(rl_w, 128)
    w_out = 2 * Hp + Np + rm_p + rl_p

    bb = max(1, min(block_batch, B))
    b_pad = _round_up(B, bb)
    if b_pad != B:
        pad = b_pad - B
        metric_repr = jnp.concatenate(
            [metric_repr, jnp.zeros((pad, N, H), metric_repr.dtype)], axis=0)
        log_repr = jnp.concatenate(
            [log_repr, jnp.zeros((pad, N, H), log_repr.dtype)], axis=0)

    def pinned(w):   # full-array block, constant index -> stays VMEM-resident
        return pl.BlockSpec(w.shape, lambda b: (0,) * w.ndim)

    weight_keys = ("wm_cat", "bm_cat", "wl_cat", "bl_cat", "w_metric", "w_log",
                   "mlp_w1", "mlp_b1", "mlp_w2", "mlp_b2")
    weights = [prepared[k] for k in weight_keys]

    in_specs = ([pl.BlockSpec((bb, N, H), lambda b: (b, 0, 0)),
                 pl.BlockSpec((bb, N, H), lambda b: (b, 0, 0))]
                + [pinned(w) for w in weights])

    # NOTE: per-block VMEM footprint grows with block_batch; re-derive the block
    # size for v7x's 64 MiB physical VMEM before scaling block_batch up.
    packed = pl.pallas_call(
        _mfa_kernel,
        out_shape=jax.ShapeDtypeStruct((b_pad, N, w_out), jnp.float32),
        grid=(b_pad // bb,),
        in_specs=in_specs,
        out_specs=pl.BlockSpec((bb, N, w_out), lambda b: (b, 0, 0)),
        compiler_params=pltpu.CompilerParams(
            dimension_semantics=("parallel",)),        # v7x: batch across both TCs
    )(metric_repr, log_repr, *weights)

    packed = packed[:B]
    off_sim = 2 * Hp
    off_rm = off_sim + Np
    off_rl = off_rm + rm_p
    weighted_m = packed[:, :, 0:H]
    weighted_l = packed[:, :, Hp:Hp + H]
    sim = packed[:, :, off_sim:off_sim + N]
    rec_m = packed[:, :, off_rm:off_rm + rm_w].reshape(B, N, n_metrics, H)
    rec_l = packed[:, :, off_rl:off_rl + rl_w].reshape(B, N, n_logs, H)

    if unbatched:
        return weighted_m[0], weighted_l[0], rec_m[0], rec_l[0], sim[0]
    return weighted_m, weighted_l, rec_m, rec_l, sim


# --------------------------------------------------------------------------- #
# Params init + pure-JAX reference
# --------------------------------------------------------------------------- #
def _xavier(key, shape):
    fan_in, fan_out = shape[0], shape[1]
    limit = jnp.sqrt(6.0 / (fan_in + fan_out))
    return jax.random.uniform(key, shape, jnp.float32, -limit, limit)


def init_params(key, n_metrics, n_logs, hidden_dim):
    H = hidden_dim
    ks = jax.random.split(key, 16)
    z = lambda k: jnp.zeros((1, k), jnp.float32)
    return {
        "W_sim": _xavier(ks[0], (H, H)),
        "Wm_w": _xavier(ks[1], (H, H)),  "Wm_b": z(H),
        "Wl_w": _xavier(ks[2], (H, H)),  "Wl_b": z(H),
        "Wm2_w": _xavier(ks[3], (H, H)), "Wm2_b": z(H),
        "Wl2_w": _xavier(ks[4], (H, H)), "Wl2_b": z(H),
        "w_metric": _xavier(ks[5], (1, H)),
        "w_log": _xavier(ks[6], (1, H)),
        "mm_w1": _xavier(ks[7], (H, 2 * H)),  "mm_b1": z(2 * H),
        "mm_w2": _xavier(ks[8], (2 * H, n_metrics * H)), "mm_b2": z(n_metrics * H),
        "ml_w1": _xavier(ks[9], (H, 2 * H)),  "ml_b1": z(2 * H),
        "ml_w2": _xavier(ks[10], (2 * H, n_logs * H)), "ml_b2": z(n_logs * H),
    }


def _reference(metric, log, params, n_metrics, n_logs):
    """Pure-JAX forward identical to the PyTorch module (eval mode)."""
    H = metric.shape[-1]
    dot = functools.partial(jnp.matmul, precision=jax.lax.Precision.HIGHEST)
    sim = jnp.tanh(dot(dot(metric, params["W_sim"]), jnp.swapaxes(log, -1, -2)))
    wm = dot(metric, params["Wm_w"]) + params["Wm_b"]
    wl = dot(log, params["Wl_w"]) + params["Wl_b"]
    wm2 = dot(metric, params["Wm2_w"]) + params["Wm2_b"]
    wl2 = dot(log, params["Wl2_w"]) + params["Wl2_b"]
    z_m = jnp.tanh(wm + dot(sim, wl))
    z_l = jnp.tanh(wl2 + dot(jnp.swapaxes(sim, -1, -2), wm2))
    a_m = jax.nn.softmax(jnp.sum(z_m * params["w_metric"], axis=-1), axis=-1)[..., None]
    a_l = jax.nn.softmax(jnp.sum(z_l * params["w_log"], axis=-1), axis=-1)[..., None]
    wmet, wlog = metric * a_m, log * a_l
    h_m = jax.nn.relu(dot(wmet, params["mm_w1"]) + params["mm_b1"])
    rec_m = (dot(h_m, params["mm_w2"]) + params["mm_b2"]).reshape(
        *wmet.shape[:-1], n_metrics, H)
    h_l = jax.nn.relu(dot(wlog, params["ml_w1"]) + params["ml_b1"])
    rec_l = (dot(h_l, params["ml_w2"]) + params["ml_b2"]).reshape(
        *wlog.shape[:-1], n_logs, H)
    return wmet, wlog, rec_m, rec_l, sim


# --------------------------------------------------------------------------- #
if __name__ == "__main__":
    n_entities, hidden_dim = 8, 32
    n_metrics, n_logs = 4, 3
    batch, block_batch = 16, 8

    key = jax.random.PRNGKey(0)
    k_m, k_l, k_p = jax.random.split(key, 3)
    metric_b = jax.random.normal(k_m, (batch, n_entities, hidden_dim), jnp.float32)
    log_b = jax.random.normal(k_l, (batch, n_entities, hidden_dim), jnp.float32)

    params = init_params(k_p, n_metrics, n_logs, hidden_dim)
    prepared = prepare_params(params, n_metrics, n_logs)   # hoisted: runs once

    fwd = jax.jit(functools.partial(multi_factor_attention,
                                    n_metrics=n_metrics, n_logs=n_logs,
                                    block_batch=block_batch))

    # Batched run (grid over batch blocks).
    outs = jax.block_until_ready(fwd(metric_b, log_b, prepared))
    wm_o, wl_o, rm_o, rl_o, sim_o = outs
    assert wm_o.shape == (batch, n_entities, hidden_dim)
    assert wl_o.shape == (batch, n_entities, hidden_dim)
    assert rm_o.shape == (batch, n_entities, n_metrics, hidden_dim)
    assert rl_o.shape == (batch, n_entities, n_logs, hidden_dim)
    assert sim_o.shape == (batch, n_entities, n_entities)

    ref = _reference(metric_b, log_b, params, n_metrics, n_logs)
    for got, want in zip(outs, ref):
        assert got.shape == want.shape
        assert bool(jnp.allclose(got, want, rtol=2e-3, atol=2e-3)), \
            float(jnp.max(jnp.abs(got - want)))

    # Unbatched, module-equivalent interface: (n_entities, hidden_dim) inputs.
    outs1 = jax.block_until_ready(fwd(metric_b[0], log_b[0], prepared))
    assert outs1[0].shape == (n_entities, hidden_dim)
    assert outs1[2].shape == (n_entities, n_metrics, hidden_dim)
    assert outs1[3].shape == (n_entities, n_logs, hidden_dim)
    assert outs1[4].shape == (n_entities, n_entities)
    assert bool(jnp.all(jnp.isfinite(outs1[4])))

    print("KERNEL_OK")
</pallas_src>

<mosaic_0001>
module attributes {stable_mosaic.version = 11 : i64} {
  func.func @_mfa_kernel(%arg0: i32, %arg1: memref<8x8x32xf32, #tpu.memory_space<vmem>>, %arg2: memref<8x8x32xf32, #tpu.memory_space<vmem>>, %arg3: memref<32x384xf32, #tpu.memory_space<vmem>>, %arg4: memref<1x384xf32, #tpu.memory_space<vmem>>, %arg5: memref<32x384xf32, #tpu.memory_space<vmem>>, %arg6: memref<1x384xf32, #tpu.memory_space<vmem>>, %arg7: memref<1x128xf32, #tpu.memory_space<vmem>>, %arg8: memref<1x128xf32, #tpu.memory_space<vmem>>, %arg9: memref<256x128xf32, #tpu.memory_space<vmem>>, %arg10: memref<1x128xf32, #tpu.memory_space<vmem>>, %arg11: memref<128x256xf32, #tpu.memory_space<vmem>>, %arg12: memref<1x256xf32, #tpu.memory_space<vmem>>, %arg13: memref<8x8x640xf32, #tpu.memory_space<vmem>>) attributes {dimension_semantics = [#tpu.dimension_semantics<parallel>], iteration_bounds = array<i64: 2>, scalar_prefetch = 0 : i64, scratch_operands = 0 : i64, tpu.core_type = #tpu.core_type<tc>, window_params = [{transform_indices = @transform_0, window_bounds = array<i64: 8, 8, 32>}, {transform_indices = @transform_1, window_bounds = array<i64: 8, 8, 32>}, {pipeline_mode = #tpu.pipeline_mode<synchronous>, transform_indices = @transform_2, window_bounds = array<i64: 32, 384>}, {pipeline_mode = #tpu.pipeline_mode<synchronous>, transform_indices = @transform_3, window_bounds = array<i64: 1, 384>}, {pipeline_mode = #tpu.pipeline_mode<synchronous>, transform_indices = @transform_4, window_bounds = array<i64: 32, 384>}, {pipeline_mode = #tpu.pipeline_mode<synchronous>, transform_indices = @transform_5, window_bounds = array<i64: 1, 384>}, {pipeline_mode = #tpu.pipeline_mode<synchronous>, transform_indices = @transform_6, window_bounds = array<i64: 1, 128>}, {pipeline_mode = #tpu.pipeline_mode<synchronous>, transform_indices = @transform_7, window_bounds = array<i64: 1, 128>}, {pipeline_mode = #tpu.pipeline_mode<synchronous>, transform_indices = @transform_8, window_bounds = array<i64: 256, 128>}, {pipeline_mode = #tpu.pipeline_mode<synchronous>, transform_indices = @transform_9, window_bounds = array<i64: 1, 128>}, {pipeline_mode = #tpu.pipeline_mode<synchronous>, transform_indices = @transform_10, window_bounds = array<i64: 128, 256>}, {pipeline_mode = #tpu.pipeline_mode<synchronous>, transform_indices = @transform_11, window_bounds = array<i64: 1, 256>}, {transform_indices = @transform_12, window_bounds = array<i64: 8, 8, 640>}]} {
    %c0 = arith.constant 0 : index
    %c0_0 = arith.constant 0 : index
    %c0_1 = arith.constant 0 : index
    %0 = vector.load %arg1[%c0, %c0_0, %c0_1] : memref<8x8x32xf32, #tpu.memory_space<vmem>>, vector<8x8x32xf32>
    %c0_2 = arith.constant 0 : index
    %c0_3 = arith.constant 0 : index
    %c0_4 = arith.constant 0 : index
    %1 = vector.load %arg2[%c0_2, %c0_3, %c0_4] : memref<8x8x32xf32, #tpu.memory_space<vmem>>, vector<8x8x32xf32>
    %2 = vector.shape_cast %0 : vector<8x8x32xf32> to vector<64x32xf32>
    %3 = vector.shape_cast %1 : vector<8x8x32xf32> to vector<64x32xf32>
    %c0_5 = arith.constant 0 : index
    %c0_6 = arith.constant 0 : index
    %4 = vector.load %arg3[%c0_5, %c0_6] : memref<32x384xf32, #tpu.memory_space<vmem>>, vector<32x384xf32>
    %cst = arith.constant dense<0.000000e+00> : vector<64x384xf32>
    %5 = tpu.matmul %2, %4, %cst {dimension_numbers = #tpu.dot_dimension_numbers<[1], [0], [0], [1], [0, 0, 1, 1], [], []>} : vector<64x32xf32>, vector<32x384xf32>, vector<64x384xf32> -> vector<64x384xf32>
    %c0_7 = arith.constant 0 : index
    %c0_8 = arith.constant 0 : index
    %6 = vector.load %arg4[%c0_7, %c0_8] : memref<1x384xf32, #tpu.memory_space<vmem>>, vector<1x384xf32>
    %7 = vector.broadcast %6 : vector<1x384xf32> to vector<64x384xf32>
    %8 = arith.addf %5, %7 : vector<64x384xf32>
    %c0_9 = arith.constant 0 : index
    %c0_10 = arith.constant 0 : index
    %9 = vector.load %arg5[%c0_9, %c0_10] : memref<32x384xf32, #tpu.memory_space<vmem>>, vector<32x384xf32>
    %cst_11 = arith.constant dense<0.000000e+00> : vector<64x384xf32>
    %10 = tpu.matmul %3, %9, %cst_11 {dimension_numbers = #tpu.dot_dimension_numbers<[1], [0], [0], [1], [0, 0, 1, 1], [], []>} : vector<64x32xf32>, vector<32x384xf32>, vector<64x384xf32> -> vector<64x384xf32>
    %c0_12 = arith.constant 0 : index
    %c0_13 = arith.constant 0 : index
    %11 = vector.load %arg6[%c0_12, %c0_13] : memref<1x384xf32, #tpu.memory_space<vmem>>, vector<1x384xf32>
    %12 = vector.broadcast %11 : vector<1x384xf32> to vector<64x384xf32>
    %13 = arith.addf %10, %12 : vector<64x384xf32>
    %14 = vector.extract_strided_slice %8 {offsets = [0, 0], sizes = [64, 32], strides = [1, 1]} : vector<64x384xf32> to vector<64x32xf32>
    %15 = vector.shape_cast %14 : vector<64x32xf32> to vector<8x8x32xf32>
    %16 = vector.extract_strided_slice %8 {offsets = [0, 128], sizes = [64, 128], strides = [1, 1]} : vector<64x384xf32> to vector<64x128xf32>
    %17 = vector.shape_cast %16 : vector<64x128xf32> to vector<8x8x128xf32>
    %18 = vector.extract_strided_slice %8 {offsets = [0, 256], sizes = [64, 128], strides = [1, 1]} : vector<64x384xf32> to vector<64x128xf32>
    %19 = vector.shape_cast %18 : vector<64x128xf32> to vector<8x8x128xf32>
    %20 = vector.extract_strided_slice %13 {offsets = [0, 0], sizes = [64, 32], strides = [1, 1]} : vector<64x384xf32> to vector<64x32xf32>
    %21 = vector.shape_cast %20 : vector<64x32xf32> to vector<8x8x32xf32>
    %22 = vector.extract_strided_slice %13 {offsets = [0, 128], sizes = [64, 128], strides = [1, 1]} : vector<64x384xf32> to vector<64x128xf32>
    %23 = vector.shape_cast %22 : vector<64x128xf32> to vector<8x8x128xf32>
    %24 = vector.extract_strided_slice %13 {offsets = [0, 256], sizes = [64, 128], strides = [1, 1]} : vector<64x384xf32> to vector<64x128xf32>
    %25 = vector.shape_cast %24 : vector<64x128xf32> to vector<8x8x128xf32>
    "tpu.trace_start"() <{level = 10 : i32, message = "bnh,bmh->bnm"}> : () -> ()
    %cst_14 = arith.constant dense<0.000000e+00> : vector<8x8x8xf32>
    %26 = tpu.matmul %15, %1, %cst_14 {dimension_numbers = #tpu.dot_dimension_numbers<[2], [2], [1], [1], [0, 0, 0, 1, 1, 1], [0], [0]>} : vector<8x8x32xf32>, vector<8x8x32xf32>, vector<8x8x8xf32> -> vector<8x8x8xf32>
    "tpu.trace_stop"() : () -> ()
    %27 = math.tanh %26 : vector<8x8x8xf32>
    "tpu.trace_start"() <{level = 10 : i32, message = "bnh,bmh->bnm"}> : () -> ()
    %cst_15 = arith.constant dense<0.000000e+00> : vector<8x8x8xf32>
    %28 = tpu.matmul %21, %0, %cst_15 {dimension_numbers = #tpu.dot_dimension_numbers<[2], [2], [1], [1], [0, 0, 0, 1, 1, 1], [0], [0]>} : vector<8x8x32xf32>, vector<8x8x32xf32>, vector<8x8x8xf32> -> vector<8x8x8xf32>
    "tpu.trace_stop"() : () -> ()
    %29 = math.tanh %28 : vector<8x8x8xf32>
    "tpu.trace_start"() <{level = 10 : i32, message = "bnm,bmh->bnh"}> : () -> ()
    %cst_16 = arith.constant dense<0.000000e+00> : vector<8x8x128xf32>
    %30 = tpu.matmul %27, %23, %cst_16 {dimension_numbers = #tpu.dot_dimension_numbers<[2], [1], [1], [2], [0, 0, 0, 1, 1, 2], [0], [0]>} : vector<8x8x8xf32>, vector<8x8x128xf32>, vector<8x8x128xf32> -> vector<8x8x128xf32>
    "tpu.trace_stop"() : () -> ()
    %31 = arith.addf %17, %30 : vector<8x8x128xf32>
    %32 = math.tanh %31 : vector<8x8x128xf32>
    "tpu.trace_start"() <{level = 10 : i32, message = "bnm,bmh->bnh"}> : () -> ()
    %cst_17 = arith.constant dense<0.000000e+00> : vector<8x8x128xf32>
    %33 = tpu.matmul %29, %19, %cst_17 {dimension_numbers = #tpu.dot_dimension_numbers<[2], [1], [1], [2], [0, 0, 0, 1, 1, 2], [0], [0]>} : vector<8x8x8xf32>, vector<8x8x128xf32>, vector<8x8x128xf32> -> vector<8x8x128xf32>
    "tpu.trace_stop"() : () -> ()
    %34 = arith.addf %25, %33 : vector<8x8x128xf32>
    %35 = math.tanh %34 : vector<8x8x128xf32>
    %c0_18 = arith.constant 0 : index
    %c0_19 = arith.constant 0 : index
    %36 = vector.load %arg7[%c0_18, %c0_19] : memref<1x128xf32, #tpu.memory_space<vmem>>, vector<1x128xf32>
    %37 = vector.shape_cast %36 : vector<1x128xf32> to vector<1x1x128xf32>
    %38 = vector.broadcast %37 : vector<1x1x128xf32> to vector<8x8x128xf32>
    %39 = arith.mulf %32, %38 : vector<8x8x128xf32>
    %cst_20 = arith.constant dense<0.000000e+00> : vector<8x8xf32>
    %40 = vector.multi_reduction <add>, %39, %cst_20 [2] : vector<8x8x128xf32> to vector<8x8xf32>
    %41 = vector.shape_cast %40 : vector<8x8xf32> to vector<8x8x1xf32>
    %c0_21 = arith.constant 0 : index
    %c0_22 = arith.constant 0 : index
    %42 = vector.load %arg8[%c0_21, %c0_22] : memref<1x128xf32, #tpu.memory_space<vmem>>, vector<1x128xf32>
    %43 = vector.shape_cast %42 : vector<1x128xf32> to vector<1x1x128xf32>
    %44 = vector.broadcast %43 : vector<1x1x128xf32> to vector<8x8x128xf32>
    %45 = arith.mulf %35, %44 : vector<8x8x128xf32>
    %cst_23 = arith.constant dense<0.000000e+00> : vector<8x8xf32>
    %46 = vector.multi_reduction <add>, %45, %cst_23 [2] : vector<8x8x128xf32> to vector<8x8xf32>
    %47 = vector.shape_cast %46 : vector<8x8xf32> to vector<8x8x1xf32>
    %cst_24 = arith.constant dense<0xFF800000> : vector<8x1xf32>
    %48 = vector.multi_reduction <maximumf>, %41, %cst_24 [1] : vector<8x8x1xf32> to vector<8x1xf32>
    %49 = vector.shape_cast %48 : vector<8x1xf32> to vector<8x1x1xf32>
    %50 = vector.broadcast %49 : vector<8x1x1xf32> to vector<8x8x1xf32>
    %51 = arith.subf %41, %50 : vector<8x8x1xf32>
    %52 = math.exp %51 : vector<8x8x1xf32>
    %cst_25 = arith.constant dense<0.000000e+00> : vector<8x1xf32>
    %53 = vector.multi_reduction <add>, %52, %cst_25 [1] : vector<8x8x1xf32> to vector<8x1xf32>
    %54 = vector.shape_cast %53 : vector<8x1xf32> to vector<8x1x1xf32>
    %55 = vector.broadcast %54 : vector<8x1x1xf32> to vector<8x8x1xf32>
    %56 = arith.divf %52, %55 : vector<8x8x1xf32>
    %cst_26 = arith.constant dense<0xFF800000> : vector<8x1xf32>
    %57 = vector.multi_reduction <maximumf>, %47, %cst_26 [1] : vector<8x8x1xf32> to vector<8x1xf32>
    %58 = vector.shape_cast %57 : vector<8x1xf32> to vector<8x1x1xf32>
    %59 = vector.broadcast %58 : vector<8x1x1xf32> to vector<8x8x1xf32>
    %60 = arith.subf %47, %59 : vector<8x8x1xf32>
    %61 = math.exp %60 : vector<8x8x1xf32>
    %cst_27 = arith.constant dense<0.000000e+00> : vector<8x1xf32>
    %62 = vector.multi_reduction <add>, %61, %cst_27 [1] : vector<8x8x1xf32> to vector<8x1xf32>
    %63 = vector.shape_cast %62 : vector<8x1xf32> to vector<8x1x1xf32>
    %64 = vector.broadcast %63 : vector<8x1x1xf32> to vector<8x8x1xf32>
    %65 = arith.divf %61, %64 : vector<8x8x1xf32>
    %66 = vector.broadcast %56 : vector<8x8x1xf32> to vector<8x8x32xf32>
    %67 = arith.mulf %0, %66 : vector<8x8x32xf32>
    %68 = vector.broadcast %65 : vector<8x8x1xf32> to vector<8x8x32xf32>
    %69 = arith.mulf %1, %68 : vector<8x8x32xf32>
    %cst_28 = arith.constant 0.000000e+00 : f32
    %70 = vector.broadcast %cst_28 : f32 to vector<8x8x96xf32>
    %71 = tpu.concatenate %67, %70, %69, %70 in 2 : vector<8x8x32xf32>, vector<8x8x96xf32>, vector<8x8x32xf32>, vector<8x8x96xf32> -> vector<8x8x256xf32>
    %72 = vector.shape_cast %71 : vector<8x8x256xf32> to vector<64x256xf32>
    %c0_29 = arith.constant 0 : index
    %c0_30 = arith.constant 0 : index
    %73 = vector.load %arg9[%c0_29, %c0_30] : memref<256x128xf32, #tpu.memory_space<vmem>>, vector<256x128xf32>
    %cst_31 = arith.constant dense<0.000000e+00> : vector<64x128xf32>
    %74 = tpu.matmul %72, %73, %cst_31 {dimension_numbers = #tpu.dot_dimension_numbers<[1], [0], [0], [1], [0, 0, 1, 1], [], []>} : vector<64x256xf32>, vector<256x128xf32>, vector<64x128xf32> -> vector<64x128xf32>
    %c0_32 = arith.constant 0 : index
    %c0_33 = arith.constant 0 : index
    %75 = vector.load %arg10[%c0_32, %c0_33] : memref<1x128xf32, #tpu.memory_space<vmem>>, vector<1x128xf32>
    %76 = vector.broadcast %75 : vector<1x128xf32> to vector<64x128xf32>
    %77 = arith.addf %74, %76 : vector<64x128xf32>
    %cst_34 = arith.constant 0.000000e+00 : f32
    %78 = vector.broadcast %cst_34 : f32 to vector<64x128xf32>
    %79 = arith.maximumf %77, %78 : vector<64x128xf32>
    %c0_35 = arith.constant 0 : index
    %c0_36 = arith.constant 0 : index
    %80 = vector.load %arg11[%c0_35, %c0_36] : memref<128x256xf32, #tpu.memory_space<vmem>>, vector<128x256xf32>
    %cst_37 = arith.constant dense<0.000000e+00> : vector<64x256xf32>
    %81 = tpu.matmul %79, %80, %cst_37 {dimension_numbers = #tpu.dot_dimension_numbers<[1], [0], [0], [1], [0, 0, 1, 1], [], []>} : vector<64x128xf32>, vector<128x256xf32>, vector<64x256xf32> -> vector<64x256xf32>
    %c0_38 = arith.constant 0 : index
    %c0_39 = arith.constant 0 : index
    %82 = vector.load %arg12[%c0_38, %c0_39] : memref<1x256xf32, #tpu.memory_space<vmem>>, vector<1x256xf32>
    %83 = vector.broadcast %82 : vector<1x256xf32> to vector<64x256xf32>
    %84 = arith.addf %81, %83 : vector<64x256xf32>
    %85 = vector.shape_cast %84 : vector<64x256xf32> to vector<8x8x256xf32>
    %cst_40 = arith.constant 0.000000e+00 : f32
    %86 = vector.broadcast %cst_40 : f32 to vector<8x8x120xf32>
    %87 = tpu.concatenate %27, %86 in 2 : vector<8x8x8xf32>, vector<8x8x120xf32> -> vector<8x8x128xf32>
    %88 = tpu.concatenate %71, %87, %85 in 2 : vector<8x8x256xf32>, vector<8x8x128xf32>, vector<8x8x256xf32> -> vector<8x8x640xf32>
    %c0_41 = arith.constant 0 : index
    %c0_42 = arith.constant 0 : index
    %c0_43 = arith.constant 0 : index
    %89 = vector.load %arg13[%c0_41, %c0_42, %c0_43] : memref<8x8x640xf32, #tpu.memory_space<vmem>>, vector<8x8x640xf32>
    tpu.vector_store %arg13[%c0_41, %c0_42, %c0_43], %88 {strides = array<i32>} : memref<8x8x640xf32, #tpu.memory_space<vmem>>, vector<8x8x640xf32>,
    return
  }
  func.func @transform_0(%arg0: i32) -> (i32, i32, i32) {
    %c0_i32 = arith.constant 0 : i32
    %c0_i32_0 = arith.constant 0 : i32
    %c0_i32_1 = arith.constant 0 : i32
    return %arg0, %c0_i32, %c0_i32_0 : i32, i32, i32
  }
  func.func @transform_1(%arg0: i32) -> (i32, i32, i32) {
    %c0_i32 = arith.constant 0 : i32
    %c0_i32_0 = arith.constant 0 : i32
    %c0_i32_1 = arith.constant 0 : i32
    return %arg0, %c0_i32, %c0_i32_0 : i32, i32, i32
  }
  func.func @transform_2(%arg0: i32) -> (i32, i32) {
    %c0_i32 = arith.constant 0 : i32
    %c0_i32_0 = arith.constant 0 : i32
    %c0_i32_1 = arith.constant 0 : i32
    return %c0_i32, %c0_i32_0 : i32, i32
  }
  func.func @transform_3(%arg0: i32) -> (i32, i32) {
    %c0_i32 = arith.constant 0 : i32
    %c0_i32_0 = arith.constant 0 : i32
    %c0_i32_1 = arith.constant 0 : i32
    return %c0_i32, %c0_i32_0 : i32, i32
  }
  func.func @transform_4(%arg0: i32) -> (i32, i32) {
    %c0_i32 = arith.constant 0 : i32
    %c0_i32_0 = arith.constant 0 : i32
    %c0_i32_1 = arith.constant 0 : i32
    return %c0_i32, %c0_i32_0 : i32, i32
  }
  func.func @transform_5(%arg0: i32) -> (i32, i32) {
    %c0_i32 = arith.constant 0 : i32
    %c0_i32_0 = arith.constant 0 : i32
    %c0_i32_1 = arith.constant 0 : i32
    return %c0_i32, %c0_i32_0 : i32, i32
  }
  func.func @transform_6(%arg0: i32) -> (i32, i32) {
    %c0_i32 = arith.constant 0 : i32
    %c0_i32_0 = arith.constant 0 : i32
    %c0_i32_1 = arith.constant 0 : i32
    return %c0_i32, %c0_i32_0 : i32, i32
  }
  func.func @transform_7(%arg0: i32) -> (i32, i32) {
    %c0_i32 = arith.constant 0 : i32
    %c0_i32_0 = arith.constant 0 : i32
    %c0_i32_1 = arith.constant 0 : i32
    return %c0_i32, %c0_i32_0 : i32, i32
  }
  func.func @transform_8(%arg0: i32) -> (i32, i32) {
    %c0_i32 = arith.constant 0 : i32
    %c0_i32_0 = arith.constant 0 : i32
    %c0_i32_1 = arith.constant 0 : i32
    return %c0_i32, %c0_i32_0 : i32, i32
  }
  func.func @transform_9(%arg0: i32) -> (i32, i32) {
    %c0_i32 = arith.constant 0 : i32
    %c0_i32_0 = arith.constant 0 : i32
    %c0_i32_1 = arith.constant 0 : i32
    return %c0_i32, %c0_i32_0 : i32, i32
  }
  func.func @transform_10(%arg0: i32) -> (i32, i32) {
    %c0_i32 = arith.constant 0 : i32
    %c0_i32_0 = arith.constant 0 : i32
    %c0_i32_1 = arith.constant 0 : i32
    return %c0_i32, %c0_i32_0 : i32, i32
  }
  func.func @transform_11(%arg0: i32) -> (i32, i32) {
    %c0_i32 = arith.constant 0 : i32
    %c0_i32_0 = arith.constant 0 : i32
    %c0_i32_1 = arith.constant 0 : i32
    return %c0_i32, %c0_i32_0 : i32, i32
  }
  func.func @transform_12(%arg0: i32) -> (i32, i32, i32) {
    %c0_i32 = arith.constant 0 : i32
    %c0_i32_0 = arith.constant 0 : i32
    %c0_i32_1 = arith.constant 0 : i32
    return %arg0, %c0_i32, %c0_i32_0 : i32, i32, i32
  }
}

</mosaic_0001>

<bundles_post_ra>
// kernel: multi_factor_attention.1
= control target key start
LH: loop header
LB: loop body
LE: loop exit
PB: predicated region body
PF: predicated region fallthrough
CT: control target
= control target key end

     0   :  { %s6423_s0 = inlined_call_operand.hbm [shape: f32[16,8,32], index: 0, kind: input, shape index: {}]   ;;  %s6424_s1 = inlined_call_operand.hbm [shape: f32[16,8,32], index: 1, kind: input, shape index: {}]   ;;  %s6425_s2 = inlined_call_operand.hbm [shape: f32[32,384], index: 2, kind: input, shape index: {}]   ;;  %s6426_s3 = inlined_call_operand.vmem [shape: f32[1,384], index: 3, kind: input, shape index: {}]   ;;  %s6427_s4 = inlined_call_operand.hbm [shape: f32[32,384], index: 4, kind: input, shape index: {}]   ;;  %s6428_s5 = inlined_call_operand.vmem [shape: f32[1,384], index: 5, kind: input, shape index: {}]   ;;  %s6429_s6 = inlined_call_operand.vmem [shape: f32[1,128], index: 6, kind: input, shape index: {}]   ;;  %s6430_s7 = inlined_call_operand.vmem [shape: f32[1,128], index: 7, kind: input, shape index: {}]   ;;  %s6431_s8 = inlined_call_operand.hbm [shape: f32[256,128], index: 8, kind: input, shape index: {}]   ;;  %s6432_s9 = inlined_call_operand.vmem [shape: f32[1,128], index: 9, kind: input, shape index: {}]   ;;  %s6433_s10 = inlined_call_operand.hbm [shape: f32[128,256], index: 10, kind: input, shape index: {}]   ;;  %s6434_s11 = inlined_call_operand.vmem [shape: f32[1,256], index: 11, kind: input, shape index: {}]   ;;  %s6435_s12 = inlined_call_operand.vmem [shape: f32[16,8,640], index: 12, kind: output, shape index: {}]  }
   0x1   :  { %6443 = sst [smem:[#allocation17_spill]] %s6423_s0 }
   0x2   :  { %6444 = sst [smem:[#allocation18_spill]] %s6425_s2 }
   0x3   :  { %6445 = sst [smem:[#allocation19_spill]] %s6427_s4 }
   0x4   :  { %6446 = sst [smem:[#allocation20_spill]] %s6429_s6 }
   0x5   :  { %6447 = sst [smem:[#allocation21_spill]] %s6430_s7 }
   0x6   :  { %6448 = sst [smem:[#allocation22_spill]] %s6431_s8 }
   0x7   :  { %6449 = sst [smem:[#allocation23_spill]] %s6432_s9 }
   0x8   :  { %6450 = sst [smem:[#allocation24_spill]] %s6434_s11 }
   0x9   :  { %17 = vsyncpa [#allocation3], 0 }
   0xa   :  { %19 = vsyncpa [#allocation3 + $0x1], 0 }
   0xb   :  { %20 = vsyncpa [#allocation5], 0 }
   0xc   :  { %22 = vsyncpa [#allocation5 + $0x1], 0 }
   0xd   :  { %23 = vsyncpa [#allocation8], 0 }
   0xe   :  { %24 = vsyncpa [#allocation11], 0  ;;  %s5441_s21 = smov 0   ;;  %s5443_s22 = smov 0  }
   0xf   :  { %s5445_s23 = smov 0   ;;  %s5447_s24 = smov 0  }
  0x10 LB: > { %s5460_s25 = sadd.s32 4294967295, %s5360_s24   ;;  %p50_p0 = scmp.ne.s32.totalorder %s5352_s22, %s5348_s21  ;;  %s5360_s24 = sphi %s5447_s24, %s6477_s24   ;;  %s5356_s23 = sphi %s5445_s23, %s6476_s23   ;;  %s5352_s22 = sphi %s5443_s22, %s6475_s22   ;;  %s5348_s21 = sphi %s5441_s21, %s6474_s21  }
  0x11   : > { %p6436_p1 = scmp.eq.s32.totalorder %s5460_s25, 0  ;;  %p4336_p2 = scmp.ge.s32.totalorder %s5360_s24, 1 }
  0x12   : > { %p323_p3 = scmp.lt.s32.totalorder %s5360_s24, 3  ;;  %s5362_s28 = smov [#allocation6]  }
  0x13   : > { %p5468_p4 = por %p6436_p1, %p50_p0  ;;  %s335_s29 = sshll.u32 %s5362_s28, 4  ;;  %s5476_s29 = int_to_ptr.vmem [resolvable:$true] %s335_s29 }
  0x14   : > { %p5472_p5 = pnand %p4336_p2, %p323_p3  ;;  %s5363_s13 = smov [#allocation7]  }
  0x15   : > { %s6451_s26 = scalar_select %p5468_p4, 1, 0 }
  0x16   : > { %s6452_s27 = scalar_select %p5472_p5, 1, 0 }
  0x17   : > { %p4921_p6 = pneg %p5472_p5  ;;  %s351_s14 = sshll.u32 %s5363_s13, 4  ;;  %s5486_s14 = int_to_ptr.vmem [resolvable:$true] %s351_s14 }
  0x18   : > { %s5364_s15 = smov [#allocation9]   ;;  %s6454_s2 = sld [smem:[#allocation18_spill]] }
  0x19   : > { %p5482_p7 = pnand %p4921_p6, %p6436_p1  ;;  %s5488_s16 = sshll.u32 %s5364_s15, 4  ;;  %s374_s16 = int_to_ptr.vmem [resolvable:$true] %s5488_s16 }
  0x1b   : > { %p5498_p9 = pneg %p5482_p7 }
  0x1e   : > { %s5138_s19 = scalar_lea.hbm %s6454_s2, 1536 }
  0x1f   : > { %p5139_p8 = scmp.ne.s32.totalorder %s6454_s2, %s5138_s19  ;;  %p5145_p12 = scmp.lt.u32.totalorder %s5138_s19, %s6454_s2 }
  0x21   : > { %p5141_p10 = pnand %p5498_p9, %p5139_p8 }
  0x23   : > { %p5142_p11 = pneg %p5141_p10 }
  0x25   : > { %p5147_p13 = pnand %p5145_p12, %p5142_p11 }
  0x27   : > { %5150 = shalt.err (!%p5147_p13)
}
  0x28   : > { %s5151_s17 = scalar_lea.vmem %s5476_s29, 1536  ;;  %p5159_p6 = scmp.lt.s32.totalorder %s5476_s29, %s5476_s29 }
  0x29   : > { %p5152_p0 = scmp.ne.s32.totalorder %s5476_s29, %s5151_s17  ;;  %p5160_p1 = scmp.lt.s32.totalorder %s5151_s17, %s5151_s17 }
  0x2b   : > { %p5154_p2 = pnand %p5152_p0, %p5498_p9  ;;  %p5161_p8 = por %p5160_p1, %p5159_p6 }
  0x2d   : > { %p5155_p3 = pneg %p5154_p2 }
  0x2f   : > { %p5162_p10 = pnand %p5161_p8, %p5155_p3 }
  0x31   : > { %5165 = shalt.err (!%p5162_p10)
}
  0x32   : > { %s5365_s18 = smov 384   ;;  %s5366_s19 = smov 24  }
  0x33   : > { %4924 = dma.hbm_to_vmem [thread:$0]  (!%p5482_p7), %s6454_s2, 1536, %s5476_s29, [#allocation5], %s5365_s18, %s5365_s18, %s5366_s19  }
  0x34   : > { %s6456_s4 = sld [smem:[#allocation19_spill]] }
  0x3a   : > { %s5166_s11 = scalar_lea.hbm %s6456_s4, 1536 }
  0x3b   : > { %p5167_p1 = scmp.ne.s32.totalorder %s6456_s4, %s5166_s11  ;;  %p5173_p13 = scmp.lt.u32.totalorder %s5166_s11, %s6456_s4 }
  0x3d   : > { %p5169_p11 = pnand %p5167_p1, %p5498_p9 }
  0x3f   : > { %p5170_p12 = pneg %p5169_p11 }
  0x41   : > { %p5175_p0 = pnand %p5173_p13, %p5170_p12 }
  0x43   : > { %5178 = shalt.err (!%p5175_p0)
}
  0x44   : > { %s5179_s29 = scalar_lea.vmem %s5486_s14, 1536  ;;  %p5187_p8 = scmp.lt.s32.totalorder %s5486_s14, %s5486_s14 }
  0x45   : > { %p5180_p2 = scmp.ne.s32.totalorder %s5486_s14, %s5179_s29  ;;  %p5188_p10 = scmp.lt.s32.totalorder %s5179_s29, %s5179_s29 }
  0x47   : > { %p5182_p3 = pnand %p5180_p2, %p5498_p9  ;;  %p5189_p1 = por %p5188_p10, %p5187_p8 }
  0x49   : > { %p5183_p6 = pneg %p5182_p3 }
  0x4b   : > { %p5190_p11 = pnand %p5189_p1, %p5183_p6 }
  0x4d   : > { %5193 = shalt.err (!%p5190_p11)
}
  0x4e   : > { %4927 = dma.hbm_to_vmem [thread:$0]  (!%p5482_p7), %s6456_s4, 1536, %s5486_s14, [#allocation8], %s5365_s18, %s5365_s18, %s5366_s19  }
  0x4f   : > { %s6457_s8 = sld [smem:[#allocation22_spill]] }
  0x55   : > { %s5194_s20 = scalar_lea.hbm %s6457_s8, 4096 }
  0x56   : > { %p5195_p12 = scmp.ne.s32.totalorder %s6457_s8, %s5194_s20  ;;  %p5201_p2 = scmp.lt.u32.totalorder %s5194_s20, %s6457_s8 }
  0x58   : > { %p5197_p13 = pnand %p5195_p12, %p5498_p9 }
  0x5a   : > { %p5198_p0 = pneg %p5197_p13 }
  0x5c   : > { %p5203_p3 = pnand %p5201_p2, %p5198_p0 }
  0x5e   : > { %5206 = shalt.err (!%p5203_p3)
}
  0x5f   : > { %s5207_s29 = scalar_lea.vmem %s374_s16, 4096  ;;  %p5215_p1 = scmp.lt.s32.totalorder %s374_s16, %s374_s16 }
  0x60   : > { %p5208_p6 = scmp.ne.s32.totalorder %s374_s16, %s5207_s29  ;;  %p5216_p11 = scmp.lt.s32.totalorder %s5207_s29, %s5207_s29 }
  0x62   : > { %p5210_p8 = pnand %p5208_p6, %p5498_p9  ;;  %p5217_p4 = por %p5216_p11, %p5215_p1 }
  0x64   : > { %p5211_p10 = pneg %p5210_p8 }
  0x66   : > { %p5218_p5 = pnand %p5217_p4, %p5211_p10 }
  0x68   : > { %5221 = shalt.err (!%p5218_p5)
}
  0x69   : > { %s6439_s14 = smov 128   ;;  %s6441_s18 = smov 8  }
  0x6a   : > { %4930 = dma.hbm_to_vmem [thread:$0]  (!%p5482_p7), %s6457_s8, 4096, %s374_s16, [#allocation8], %s6439_s14, %s6439_s14, %s6441_s18  }
  0x6b   : > { %s5369_s7 = smov [#allocation10]   ;;  %s5222_s21 = scalar_lea.hbm %s6433_s10, 4096 }
  0x6c   : > { %s389_s9 = sshll.u32 %s5369_s7, 4  ;;  %p5223_p4 = scmp.ne.s32.totalorder %s6433_s10, %s5222_s21  ;;  %s390_s9 = int_to_ptr.vmem [resolvable:$true] %s389_s9 }
  0x6d   : > { %p5229_p13 = scmp.lt.u32.totalorder %s5222_s21, %s6433_s10 }
  0x6e   : > { %p5225_p5 = pnand %p5223_p4, %p5498_p9 }
  0x70   : > { %p5226_p12 = pneg %p5225_p5 }
  0x72   : > { %p5231_p0 = pnand %p5229_p13, %p5226_p12 }
  0x74   : > { %5234 = shalt.err (!%p5231_p0)
}
  0x75   : > { %s5235_s16 = scalar_lea.vmem %s390_s9, 4096  ;;  %p5243_p8 = scmp.lt.s32.totalorder %s390_s9, %s390_s9 }
  0x76   : > { %p5236_p2 = scmp.ne.s32.totalorder %s390_s9, %s5235_s16  ;;  %p5244_p10 = scmp.lt.s32.totalorder %s5235_s16, %s5235_s16 }
  0x78   : > { %p5238_p3 = pnand %p5236_p2, %p5498_p9  ;;  %p5245_p1 = por %p5244_p10, %p5243_p8 }
  0x7a   : > { %p5239_p6 = pneg %p5238_p3 }
  0x7c   : > { %p5246_p11 = pnand %p5245_p1, %p5239_p6 }
  0x7e   : > { %5249 = shalt.err (!%p5246_p11)
}
  0x7f   : > { %s5370_s19 = smov 256   ;;  %s5371_s28 = smov 16  }
  0x80   : > { %4933 = dma.hbm_to_vmem [thread:$0]  (!%p5482_p7), %s6433_s10, 4096, %s390_s9, [#allocation11], %s5370_s19, %s5370_s19, %s5371_s28  }
  0x81   : > { %s5583_s11 = sadd.s32 1, %s5360_s24   ;;  %s37_s21 = sadd.s32 1, %s5356_s23 }
  0x82   : > { %s34_s20 = ssub.s32 %s5360_s24, %s5583_s11  ;;  %p44_p4 = scmp.ne.s32.totalorder %s5356_s23, %s5352_s22 }
  0x83   : > { %p35_p9 = scmp.eq.s32.totalorder %s34_s20, 0  ;;  %p45_p5 = scmp.eq.s32.totalorder %s5360_s24, 0 }
  0x84   : > { %p4945_p13 = scmp.lt.s32.totalorder %s5360_s24, 2  ;;  %s406_s15 = sand.u32 1, %s5356_s23  }
  0x85   : > { %s5592_s13 = scalar_select %p35_p9, %s5356_s23, %s37_s21  }
  0x86   : > { %p46_p12 = por %p45_p5, %p44_p4  ;;  %s4458_s17 = sshll.u32 %s5360_s24, 10 }
  0x87   : > { %s5597_s29 = sshll.u32 %s406_s15, 6  ;;  %s6458_s0 = sld [smem:[#allocation17_spill]] }
  0x88   : > { %s410_s19 = scalar_lea.vmem [#allocation2], %s5597_s29  ;;  %p5605_p7 = pnand %p4945_p13, %p46_p12 }
  0x89   : > { %s417_s28 = sshll.u32 %s410_s19, 4  ;;  %s5614_s21 = scalar_lea.hbm %s6424_s1, %s4458_s17  ;;  %s5609_s28 = int_to_ptr.vmem [resolvable:$true] %s417_s28 }
  0x8a   : > { %s5616_s30 = scalar_lea.sflag [#allocation3], %s406_s15  ;;  %p5252_p2 = pneg %p5605_p7 }
  0x8d   : > { %s5602_s9 = scalar_lea.hbm %s6458_s0, %s4458_s17  ;;  %s5255_s18 = scalar_lea.hbm %s6458_s0, 2048 }
  0x8e   : > { %s5250_s16 = scalar_lea.hbm %s5602_s9, 1024  ;;  %p5256_p8 = scmp.lt.u32.totalorder %s5602_s9, %s6458_s0 }
  0x8f   : > { %p5251_p0 = scmp.ne.s32.totalorder %s5602_s9, %s5250_s16  ;;  %p5257_p10 = scmp.lt.u32.totalorder %s5255_s18, %s5250_s16 }
  0x90   : > { %p5259_p11 = scmp.lt.u32.totalorder %s5250_s16, %s5602_s9 }
  0x91   : > { %p5253_p3 = pnand %p5252_p2, %p5251_p0  ;;  %p5258_p1 = por %p5257_p10, %p5256_p8 }
  0x93   : > { %p5254_p6 = pneg %p5253_p3  ;;  %p5260_p9 = por %p5259_p11, %p5258_p1 }
  0x95   : > { %p5261_p4 = pnand %p5260_p9, %p5254_p6 }
  0x97   : > { %5264 = shalt.err (!%p5261_p4)
}
  0x98   : > { %s5265_s15 = scalar_lea.vmem %s5609_s28, 1024  ;;  %s5372_s14 = smov [#allocation2]  }
  0x99   : > { %p5266_p5 = scmp.ne.s32.totalorder %s5609_s28, %s5265_s15  ;;  %s5270_s17 = sshll.u32 %s5372_s14, 4  ;;  %s5271_s17 = int_to_ptr.vmem [resolvable:$false] %s5270_s17 }
  0x9a   : > { %s5272_s2 = scalar_lea.vmem %s5271_s17, 2048  ;;  %p5273_p0 = scmp.lt.s32.totalorder %s5609_s28, %s5271_s17 }
  0x9b   : > { %p5268_p12 = pnand %p5266_p5, %p5252_p2  ;;  %p5274_p3 = scmp.lt.s32.totalorder %s5272_s2, %s5265_s15 }
  0x9d   : > { %p5269_p13 = pneg %p5268_p12  ;;  %p5275_p8 = por %p5274_p3, %p5273_p0 }
  0x9f   : > { %p5276_p10 = pnand %p5275_p8, %p5269_p13 }
  0xa1   : > { %5279 = shalt.err (!%p5276_p10)
}
  0xa2   : > { %s6460_s4 = smov 8   ;;  %s6461_s18 = smov 128  }
  0xa3   : > { %4937 = dma.hbm_to_vmem [thread:$0]  (!%p5605_p7), %s5602_s9, 1024, %s5609_s28, %s5616_s30, %s6461_s18, %s6461_s18, %s6460_s4  }
  0xa4   : > { %s431_s7 = scalar_lea.vmem [#allocation4], %s5597_s29  ;;  %s427_s16 = sand.u32 1, %s5360_s24  }
  0xa5   : > { %s438_s20 = sshll.u32 %s431_s7, 4  ;;  %s5651_s19 = scalar_lea.sflag [#allocation5], %s427_s16  ;;  %s5649_s20 = int_to_ptr.vmem [resolvable:$true] %s438_s20 }
  0xa6   : > { %s5280_s15 = scalar_lea.hbm %s5614_s21, 1024  ;;  %s5285_s2 = scalar_lea.hbm %s6424_s1, 2048 }
  0xa7   : > { %p5281_p6 = scmp.ne.s32.totalorder %s5614_s21, %s5280_s15  ;;  %p5286_p9 = scmp.lt.u32.totalorder %s5614_s21, %s6424_s1 }
  0xa8   : > { %p5287_p4 = scmp.lt.u32.totalorder %s5285_s2, %s5280_s15  ;;  %p5289_p12 = scmp.lt.u32.totalorder %s5280_s15, %s5614_s21 }
  0xa9   : > { %p5283_p1 = pnand %p5281_p6, %p5252_p2 }
  0xaa   : > { %p5288_p5 = por %p5287_p4, %p5286_p9 }
  0xab   : > { %p5284_p11 = pneg %p5283_p1 }
  0xac   : > { %p5290_p13 = por %p5289_p12, %p5288_p5 }
  0xae   : > { %p5291_p0 = pnand %p5290_p13, %p5284_p11 }
  0xb0   : > { %5294 = shalt.err (!%p5291_p0)
}
  0xb1   : > { %s5295_s24 = scalar_lea.vmem %s5649_s20, 1024  ;;  %s5373_s29 = smov [#allocation4]  }
  0xb2   : > { %p5296_p3 = scmp.ne.s32.totalorder %s5649_s20, %s5295_s24  ;;  %s5300_s9 = sshll.u32 %s5373_s29, 4  ;;  %s5301_s9 = int_to_ptr.vmem [resolvable:$false] %s5300_s9 }
  0xb3   : > { %s5302_s0 = scalar_lea.vmem %s5301_s9, 2048  ;;  %p5303_p6 = scmp.lt.s32.totalorder %s5649_s20, %s5301_s9 }
  0xb4   : > { %p5298_p8 = pnand %p5296_p3, %p5252_p2  ;;  %p5304_p1 = scmp.lt.s32.totalorder %s5302_s0, %s5295_s24 }
  0xb6   : > { %p5299_p10 = pneg %p5298_p8  ;;  %p5305_p9 = por %p5304_p1, %p5303_p6 }
  0xb8   : > { %p5306_p4 = pnand %p5305_p9, %p5299_p10 }
  0xba   : > { %5309 = shalt.err (!%p5306_p4)
}
  0xbb   : > { %4940 = dma.hbm_to_vmem [thread:$0]  (!%p5605_p7), %s5614_s21, 1024, %s5649_s20, %s5651_s19, %s6461_s18, %s6461_s18, %s6460_s4  }
  0xbc   : > { %p6462_p2 = scmp.ne.s32.totalorder %s6452_s27, 0 }
  0xbd   : > { %s452_s8 = sand.u32 (!%p6462_p2), 1, %s5352_s22   ;;  %p6463_p11 = scmp.ne.s32.totalorder (!%p6462_p2), %s6451_s26, 0 }
  0xbe   : > { %450 = sbr.rel (%p6462_p2) target bundleno = 1590 (0x636), region = 68  ;;  %s4349_s28 = sshll.u32 (!%p6462_p2), %s452_s8, 6 }
  0xbf   : > { %s453_s30 = scalar_lea.sflag (!%p6462_p2), [#allocation3], %s452_s8  ;;  %s5683_s7 = scalar_lea.vmem (!%p6462_p2), [#allocation2], %s4349_s28 }
  0xc5   : > { %5327 = dma.done.wait (%p6463_p11), %s453_s30, 1024  }
  0xc6   : > { %5329 = vsyncadd (%p6463_p11), %s453_s30, 4294966272  ;;  %s461_s6 = sand.u32 1, %s5460_s25   ;;  %s5690_s21 = scalar_lea.vmem [#allocation4], %s4349_s28 }
  0xc7   : > { %s462_s16 = scalar_lea.sflag [#allocation5], %s461_s6 }
  0xc8   : > { %5331 = dma.done.wait (%p6463_p11), %s462_s16, 1024  }
  0xc9   : > { %5333 = vsyncadd (%p6463_p11), %s462_s16, 4294966272  ;;  %p6464_p7 = scmp.eq.s32.totalorder %s5460_s25, 0 }
  0xcb   : > { %5335 = dma.done.wait (%p6464_p7), [#allocation5], 1536   ;;  %p6465_p5 = pmov %p6464_p7 }
  0xcd   : > { %5337 = vsyncadd (%p6465_p5), [#allocation5], 4294965760  ;;  %p6466_p12 = pmov %p6465_p5 }
  0xce   : > { %p6467_p13 = pmov %p6465_p5 }
  0xcf   : > { %5339 = dma.done.wait (%p6466_p12), [#allocation8], 5632  }
  0xd0   : > { %5341 = vsyncadd (%p6467_p13), [#allocation8], 4294961664  ;;  %p6468_p0 = pmov %p6465_p5 }
  0xd2   : > { %5343 = dma.done.wait (%p6468_p0), [#allocation11], 4096   ;;  %p6469_p3 = pmov %p6468_p0 }
  0xd3   : > { %v5374_v0 = vmov 0.0   ;;  %v554_v1 = vld [vmem:[#allocation6 + $0x8] sm:$0xff]  ;;  %v557_v2 = vld [vmem:[#allocation6 + $0x20] sm:$0xff]  ;;  %v555_v3 = vld [vmem:[#allocation6 + $0x10] sm:$0xff]  ;;  %vm582_vm0 = vcmask 261120   ;;  %vm5375_vm1 = vmmov 0   ;;  %v567_v53 = vlaneseq }
  0xd4   : > { %5345 = vsyncadd (%p6469_p3), [#allocation11], 4294963200  ;;  %671 = vmatprep.mubr.f32.mxu0 %v5374_v0  ;;  %v4804_v4 = vpack.c.bf16 %v557_v2, %v554_v1  ;;  %v558_v5 = vld [vmem:[#allocation6 + $0x28] sm:$0xff]  ;;  %v553_v6 = vld [vmem:[#allocation6] sm:$0xff]  ;;  %s4355_s20 = sshll.u32 %s5460_s25, 3  ;;  %vm2280_vm2 = vcmask 64512  }
  0xd5   : > { %v556_v7 = vld [vmem:[#allocation6 + $0x18] sm:$0xff]  ;;  %v4812_v8 = vpack.c.bf16 %v558_v5, %v555_v3  ;;  %v563_v11 = vld [vmem:[#allocation6 + $0x50] sm:$0xff]  ;;  %v561_v12 = vld [vmem:[#allocation6 + $0x40] sm:$0xff]  ;;  %v5818_v54 = vshrl.u32 %v567_v53, 7  ;;  %p531_p8 = scmp.lt.s32.totalorder %s4355_s20, 15  ;;  %s6470_s24 = sld [smem:[#allocation21_spill]] }
  0xd6   : > { %v4806_v9 = vpack.c.bf16 %v556_v7, %v553_v6  ;;  %v560_v10 = vld [vmem:[#allocation6 + $0x38] sm:$0xff]  ;;  %4805 = vmatprep.subr.bf16.mxu0 %v4804_v4  ;;  %v559_v15 = vld [vmem:[#allocation6 + $0x30] sm:$0xff]  ;;  %v562_v16 = vld [vmem:[#allocation6 + $0x48] sm:$0xff]  ;;  %s6471_s0 = sld [smem:[#allocation20_spill]]  ;;  %s6472_s30 = sld [smem:[#allocation23_spill]] }
  0xd7   : > { %v4808_v13 = vpack.c.bf16 %v563_v11, %v560_v10  ;;  %v564_v14 = vld [vmem:[#allocation6 + $0x58] sm:$0xff]  ;;  %4813 = vmatprep.subr.bf16.mxu1 %v4812_v8  ;;  %v4810_v18 = vpack.c.bf16 %v562_v16, %v559_v15  ;;  %v5710_v19 = vld [vmem:[%s5683_s7] sm:$0xff]  ;;  %v826_v20 = vld [vmem:[#allocation7 + $0x8] sm:$0xff]  ;;  %v577_v55 = vsub.s32 2, %v5818_v54  ;;  %v5832_v58 = vsub.s32 0, %v5818_v54  ;;  %s6479_s20 = smov (!%p531_p8, %s4355_s20), 15 }
  0xd8   : > { %4807 = vmatpush1.bf16.msra.mxu0 %v4806_v9  ;;  %v4816_v17 = vpack.c.bf16 %v564_v14, %v561_v12  ;;  %4815 = vmatpush3.bf16.msra.mxu1 %v4812_v8  ;;  %v829_v21 = vld [vmem:[#allocation7 + $0x20] sm:$0xff]  ;;  %v828_v24 = vld [vmem:[#allocation7 + $0x18] sm:$0xff]  ;;  %v835_v26 = vld [vmem:[#allocation7 + $0x50] sm:$0xff]  ;;  %s4900_s19 = smul.u32 40, %s6479_s20  ;;  %s6473_s16 = sld [smem:[#allocation24_spill]] }
  0xd9   : > { %4809 = vmatprep.subr.bf16.mxu0 %v4808_v13  ;;  %4612 = vmatprep.mubr.msk.f32.mxu1 %vm582_vm0, %v5710_v19  ;;  %v825_v22 = vld [vmem:[#allocation7] sm:$0xff]  ;;  %v4820_v23 = vpack.c.bf16 %v829_v21, %v826_v20  ;;  %v832_v25 = vld [vmem:[#allocation7 + $0x38] sm:$0xff]  ;;  %v5715_v27 = vld [vmem:[%s5683_s7 + $0x8] sm:$0xff] }
  0xda   : > { %4817 = vmatprep.subr.bf16.mxu1 %v4816_v17  ;;  %v4822_v28 = vpack.c.bf16 %v828_v24, %v825_v22  ;;  %v5718_v29 = vld [vmem:[%s5683_s7 + $0x10] sm:$0xff]  ;;  %v4824_v30 = vpack.c.bf16 %v835_v26, %v832_v25  ;;  %v834_v32 = vld [vmem:[#allocation7 + $0x48] sm:$0xff]  ;;  %v833_v35 = vld [vmem:[#allocation7 + $0x40] sm:$0xff]  ;;  %s6043_s17 = scalar_lea.vmem %s6435_s12, %s4900_s19 }
  0xdb   : > { %v831_v31 = vld [vmem:[#allocation7 + $0x30] sm:$0xff]  ;;  %v830_v34 = vld [vmem:[#allocation7 + $0x28] sm:$0xff]  ;;  %v5728_v36 = vld [vmem:[%s5683_s7 + $0x18] sm:$0xff] }
  0xdc   : > { %4811 = vmatpush1.bf16.msra.mxu0 %v4810_v18  ;;  %4819 = vmatpush3.bf16.msra.mxu1 %v4816_v17  ;;  %v827_v33 = vld [vmem:[#allocation7 + $0x10] sm:$0xff]  ;;  %v4826_v37 = vpack.c.bf16 %v834_v32, %v831_v31  ;;  %v836_v39 = vld [vmem:[#allocation7 + $0x58] sm:$0xff]  ;;  %v5731_v40 = vld [vmem:[%s5683_s7 + $0x20] sm:$0xff]  ;;  %v5907_v31 = vsub.s32 1, %v5818_v54 }
  0xdd   : > { %4821 = vmatprep.subr.bf16.mxu1 %v4820_v23  ;;  %v4828_v38 = vpack.c.bf16 %v830_v34, %v827_v33  ;;  %v4832_v41 = vpack.c.bf16 %v836_v39, %v833_v35  ;;  %v5741_v42 = vld [vmem:[%s5683_s7 + $0x28] sm:$0xff]  ;;  %v5744_v43 = vld [vmem:[%s5683_s7 + $0x30] sm:$0xff]  ;;  %v5755_v44 = vld [vmem:[%s5683_s7 + $0x38] sm:$0xff] }
  0xde   : > { %v545_v45 = vld [vmem:[%s5690_s21] sm:$0xff]  ;;  %v546_v46 = vld [vmem:[%s5690_s21 + $0x8] sm:$0xff]  ;;  %v547_v47 = vld [vmem:[%s5690_s21 + $0x10] sm:$0xff] }
  0xdf   : > { %4357 = vmatmul.mubr.msk.f32.vlgmr.msra.gmra.mrb[0].mxu0 %vm582_vm0, %v5710_v19  ;;  %4613 = vmatmul.mubr.msk.f32.vlgmr.msra.gmra.mrb[0].mxu1 %vm582_vm0, %v5715_v27  ;;  %v548_v48 = vld [vmem:[%s5690_s21 + $0x18] sm:$0xff]  ;;  %v549_v49 = vld [vmem:[%s5690_s21 + $0x20] sm:$0xff]  ;;  %v550_v50 = vld [vmem:[%s5690_s21 + $0x28] sm:$0xff] }
  0xe0   : > { %677 = vmatprep.mubr.f32.mxu0 %v5374_v0  ;;  %4615 = vmatprep.mubr.msk.f32.mxu1 %vm582_vm0, %v5718_v29  ;;  %v551_v51 = vld [vmem:[%s5690_s21 + $0x30] sm:$0xff]  ;;  %v5808_v52 = vld [vmem:[%s5690_s21 + $0x38] sm:$0xff]  ;;  %v5824_v56 = vld [vmem:[%s6428_s5] sm:$0x7] }
  0xe1   : > { %4823 = vmatpush1.bf16.msra.mxu1 %v4822_v28  ;;  %4829 = vmatprep.subr.bf16.mxu0 %v4828_v38  ;;  %v5829_v57 = vrot.slane %v5824_v56, %v577_v55  ;;  %v5837_v59 = vld [vmem:[%s6426_s3] sm:$0x7]  ;;  %v5912_v32 = vrot.slane %v5824_v56, %v5832_v58 }
  0xe2   : > { %4825 = vmatprep.subr.bf16.mxu1 %v4824_v30  ;;  %4831 = vmatpush3.bf16.msra.mxu0 %v4828_v38  ;;  %v5841_v60 = vrot.slane %v5837_v59, %v5832_v58 }
  0xe3   : > { %4358 = vmatmul.mubr.msk.f32.gmra.mrb[2].mxu0 %vm582_vm0, %v5715_v27  ;;  %4616 = vmatmul.mubr.msk.f32.gmra.mrb[2].mxu1 %vm582_vm0, %v5728_v36 }
  0xe4   : > { %683 = vmatprep.mubr.f32.mxu0 %v5374_v0  ;;  %4618 = vmatprep.mubr.msk.f32.mxu1 %vm582_vm0, %v5731_v40 }
  0xe5   : > { %4827 = vmatpush1.bf16.msra.mxu1 %v4826_v37  ;;  %4833 = vmatprep.subr.bf16.mxu0 %v4832_v41  ;;  %v5923_v37 = vrot.slane %v5824_v56, %v5907_v31 }
  0xe6   : > { %4649 = vmatprep.subr.mxu1 %v5374_v0  ;;  %4835 = vmatpush3.bf16.msra.mxu0 %v4832_v41 }
  0xe7   : > { %4359 = vmatmul.mubr.msk.f32.gmra.mrb[4].mxu0 %vm582_vm0, %v5718_v29  ;;  %4619 = vmatmul.mubr.msk.f32.gmra.mrb[4].mxu1 %vm582_vm0, %v5741_v42 }
  0xe8   : > { %689 = vmatprep.mubr.f32.mxu0 %v5374_v0  ;;  %4621 = vmatprep.mubr.msk.f32.mxu1 %vm582_vm0, %v5744_v43 }
  0xe9   : > { %4644 = vmatprep.subr.mxu0 %v5374_v0 }
  0xeb   : > { %4360 = vmatmul.mubr.msk.f32.gmra.mrb[6].mxu0 %vm582_vm0, %v5728_v36  ;;  %4622 = vmatmul.mubr.msk.f32.gmra.mrb[6].mxu1 %vm582_vm0, %v5755_v44 }
  0xec   : > { %695 = vmatprep.mubr.f32.mxu0 %v5374_v0  ;;  %942 = vmatprep.mubr.f32.mxu1 %v5374_v0 }
  0xef   : > { %4361 = vmatmul.mubr.msk.f32.gmra.mrb[8].mxu0 %vm582_vm0, %v5731_v40  ;;  %4373 = vmatmul.mubr.msk.f32.vlgmr.msra.gmra.mrb[8].mxu1 %vm582_vm0, %v545_v45 }
  0xf0   : > { %701 = vmatprep.mubr.f32.mxu0 %v5374_v0  ;;  %948 = vmatprep.mubr.f32.mxu1 %v5374_v0 }
  0xf1   : > { %4650 = vmatpush3.xpose.msk.msra.mxu1 %vm582_vm0, %v546_v46 }
  0xf2   : > { %4659 = vmatprep.subr.mxu1 %v5374_v0 }
  0xf3   : > { %4362 = vmatmul.mubr.msk.f32.gmra.mrb[10].mxu0 %vm582_vm0, %v5741_v42  ;;  %4374 = vmatmul.mubr.msk.f32.gmra.mrb[10].mxu1 %vm582_vm0, %v546_v46 }
  0xf4   : > { %707 = vmatprep.mubr.f32.mxu0 %v5374_v0  ;;  %954 = vmatprep.mubr.f32.mxu1 %v5374_v0 }
  0xf7   : > { %4363 = vmatmul.mubr.msk.f32.gmra.mrb[12].mxu0 %vm582_vm0, %v5744_v43  ;;  %4375 = vmatmul.mubr.msk.f32.gmra.mrb[12].mxu1 %vm582_vm0, %v547_v47 }
  0xf8   : > { %713 = vmatprep.mubr.f32.mxu0 %v5374_v0  ;;  %960 = vmatprep.mubr.f32.mxu1 %v5374_v0 }
  0xfb   : > { %4364 = vmatmul.mubr.msk.f32.gmra.mrb[14].mxu0 %vm582_vm0, %v5755_v44  ;;  %4376 = vmatmul.mubr.msk.f32.gmra.mrb[14].mxu1 %vm582_vm0, %v548_v48 }
  0xfc   : > { %4632 = vmatprep.mubr.msk.f32.mxu0 %vm582_vm0, %v545_v45  ;;  %966 = vmatprep.mubr.f32.mxu1 %v5374_v0 }
  0xff   : > { %4633 = vmatmul.mubr.msk.f32.vlgmr.msra.gmra.mrb[16].mxu0 %vm582_vm0, %v546_v46  ;;  %4377 = vmatmul.mubr.msk.f32.gmra.mrb[16].mxu1 %vm582_vm0, %v549_v49 }
 0x100   : > { %4635 = vmatprep.mubr.msk.f32.mxu0 %vm582_vm0, %v547_v47  ;;  %972 = vmatprep.mubr.f32.mxu1 %v5374_v0 }
 0x101   : > { %4645 = vmatpush3.xpose.msk.msra.mxu0 %vm582_vm0, %v545_v45 }
 0x102   : > { %4654 = vmatprep.subr.mxu0 %v5374_v0 }
 0x103   : > { %4636 = vmatmul.mubr.msk.f32.gmra.mrb[18].mxu0 %vm582_vm0, %v548_v48  ;;  %4378 = vmatmul.mubr.msk.f32.gmra.mrb[18].mxu1 %vm582_vm0, %v550_v50 }
 0x104   : > { %4638 = vmatprep.mubr.msk.f32.mxu0 %vm582_vm0, %v549_v49  ;;  %978 = vmatprep.mubr.f32.mxu1 %v5374_v0 }
 0x107   : > { %4639 = vmatmul.mubr.msk.f32.gmra.mrb[20].mxu0 %vm582_vm0, %v550_v50  ;;  %4379 = vmatmul.mubr.msk.f32.gmra.mrb[20].mxu1 %vm582_vm0, %v551_v51 }
 0x108   : > { %4641 = vmatprep.mubr.msk.f32.mxu0 %vm582_vm0, %v551_v51  ;;  %984 = vmatprep.mubr.f32.mxu1 %v5374_v0 }
 0x10b   : > { %4642 = vmatmul.mubr.msk.f32.gmra.mrb[22].mxu0 %vm582_vm0, %v5808_v52  ;;  %4380 = vmatmul.mubr.msk.f32.gmra.mrb[22].mxu1 %vm582_vm0, %v5808_v52 }
 0x10c   : > { %4646 = vmatprep.mubr.msk.f32.mxu0 %vm5375_vm1, %v5374_v0  ;;  %4651 = vmatprep.mubr.msk.f32.mxu1 %vm5375_vm1, %v5374_v0 }
 0x1b2   : > { %v673_v61 = vpop.f32.mrb[0].mxu0  ;;  %v5846_v1 = vpop.f32.mrb[0].mxu1 }
 0x1b3   : > { %v674_v62 = vadd.f32 %v673_v61, %v5841_v60  ;;  %v5844_v63 = vpop.f32.mrb[1].mxu0  ;;  %v5848_v2 = vpop.f32.mrb[1].mxu1 }
 0x1b5   : > { %4647 = vmatmul.mubr.msk.f32.vlgmr.msra.gmra.mrb[24].mxu0 %vm582_vm0, %v674_v62 }
 0x1b6   : > { %v679_v3 = vpop.f32.mrb[2].mxu0  ;;  %4655 = vmatpush3.xpose.msk.msra.mxu0 %vm582_vm0, %v547_v47  ;;  %4656 = vmatprep.mubr.msk.f32.mxu0 %vm5375_vm1, %v5374_v0  ;;  %v5857_v6 = vpop.f32.mrb[2].mxu1 }
 0x1b7   : > { %v680_v4 = vadd.f32 %v679_v3, %v5841_v60  ;;  %v5855_v5 = vpop.f32.mrb[3].mxu0  ;;  %4664 = vmatprep.subr.mxu0 %v5374_v0  ;;  %v5860_v7 = vpop.f32.mrb[3].mxu1 }
 0x1b9   : > { %4652 = vmatmul.mubr.msk.f32.vlgmr.msra.gmra.mrb[24].mxu1 %vm582_vm0, %v680_v4 }
 0x1ba   : > { %v685_v8 = vpop.f32.mrb[4].mxu0  ;;  %4660 = vmatpush3.xpose.msk.msra.mxu1 %vm582_vm0, %v548_v48  ;;  %4661 = vmatprep.mubr.msk.f32.mxu1 %vm5375_vm1, %v5374_v0  ;;  %v5869_v11 = vpop.f32.mrb[4].mxu1 }
 0x1bb   : > { %v686_v9 = vadd.f32 %v685_v8, %v5841_v60  ;;  %v5867_v10 = vpop.f32.mrb[5].mxu0  ;;  %4669 = vmatprep.subr.mxu1 %v5374_v0  ;;  %v5872_v12 = vpop.f32.mrb[5].mxu1 }
 0x1bd   : > { %4657 = vmatmul.mubr.msk.f32.vlgmr.msra.gmra.mrb[26].mxu0 %vm582_vm0, %v686_v9 }
 0x1be   : > { %v691_v13 = vpop.f32.mrb[6].mxu0  ;;  %4665 = vmatpush3.xpose.msk.msra.mxu0 %vm582_vm0, %v549_v49  ;;  %4666 = vmatprep.mubr.msk.f32.mxu0 %vm5375_vm1, %v5374_v0  ;;  %v5882_v16 = vpop.f32.mrb[6].mxu1 }
 0x1bf   : > { %v692_v14 = vadd.f32 %v691_v13, %v5841_v60  ;;  %v5879_v15 = vpop.f32.mrb[7].mxu0  ;;  %4674 = vmatprep.subr.mxu0 %v5374_v0  ;;  %v5884_v17 = vpop.f32.mrb[7].mxu1 }
 0x1c1   : > { %4662 = vmatmul.mubr.msk.f32.vlgmr.msra.gmra.mrb[26].mxu1 %vm582_vm0, %v692_v14 }
 0x1c2   : > { %v697_v18 = vpop.f32.mrb[8].mxu0  ;;  %4670 = vmatpush3.xpose.msk.msra.mxu1 %vm582_vm0, %v550_v50  ;;  %4671 = vmatprep.mubr.msk.f32.mxu1 %vm5375_vm1, %v5374_v0  ;;  %v944_v22 = vpop.f32.mrb[8].mxu1 }
 0x1c3   : > { %v698_v20 = vadd.f32 %v697_v18, %v5841_v60  ;;  %v5891_v21 = vpop.f32.mrb[9].mxu0  ;;  %4679 = vmatprep.subr.mxu1 %v5374_v0  ;;  %v5894_v23 = vpop.f32.mrb[9].mxu1  ;;  %v945_v41 = vadd.f32 %v944_v22, %v5912_v32 }
 0x1c5   : > { %4667 = vmatmul.mubr.msk.f32.vlgmr.msra.gmra.mrb[28].mxu0 %vm582_vm0, %v698_v20 }
 0x1c6   : > { %v703_v24 = vpop.f32.mrb[10].mxu0  ;;  %4675 = vmatpush3.xpose.msk.msra.mxu0 %vm582_vm0, %v551_v51  ;;  %4676 = vmatprep.mubr.msk.f32.mxu0 %vm5375_vm1, %v5374_v0  ;;  %v950_v28 = vpop.f32.mrb[10].mxu1 }
 0x1c7   : > { %v704_v25 = vadd.f32 %v703_v24, %v5841_v60  ;;  %v5901_v26 = vpop.f32.mrb[11].mxu0  ;;  %4684 = vmatprep.subr.mxu0 %v5374_v0  ;;  %v5904_v30 = vpop.f32.mrb[11].mxu1  ;;  %v951_v51 = vadd.f32 %v950_v28, %v5912_v32 }
 0x1c9   : > { %4672 = vmatmul.mubr.msk.f32.vlgmr.msra.gmra.mrb[28].mxu1 %vm582_vm0, %v704_v25 }
 0x1ca   : > { %v709_v33 = vpop.f32.mrb[12].mxu0  ;;  %4680 = vmatpush3.xpose.msk.msra.mxu1 %vm582_vm0, %v5808_v52  ;;  %4681 = vmatprep.mubr.msk.f32.mxu1 %vm5375_vm1, %v5374_v0  ;;  %v956_v38 = vpop.f32.mrb[12].mxu1 }
 0x1cb   : > { %v710_v34 = vadd.f32 %v709_v33, %v5841_v60  ;;  %v5919_v35 = vpop.f32.mrb[13].mxu0  ;;  %4689 = vmatprep.subr.mxu1 %v5374_v0  ;;  %v958_v39 = vpop.f32.mrb[13].mxu1 }
 0x1cc   : > { %v5929_v45 = vadd.f32 %v958_v39, %v5923_v37 }
 0x1cd   : > { %4677 = vmatmul.mubr.msk.f32.vlgmr.msra.gmra.mrb[30].mxu0 %vm582_vm0, %v710_v34  ;;  %v947_v34 = vadd.f32 %v5894_v23, %v5923_v37 }
 0x1ce   : > { %4685 = vmatpush3.xpose.msk.msra.mxu0 %vm582_vm0, %v5710_v19  ;;  %v715_v46 = vpop.f32.mrb[14].mxu0  ;;  %4686 = vmatprep.mubr.msk.f32.mxu0 %vm5375_vm1, %v5374_v0  ;;  %v962_v49 = vpop.f32.mrb[14].mxu1  ;;  %v957_v19 = vadd.f32 %v956_v38, %v5912_v32 }
 0x1cf   : > { %v716_v47 = vadd.f32 %v715_v46, %v5841_v60  ;;  %v5936_v48 = vpop.f32.mrb[15].mxu0  ;;  %4694 = vmatprep.subr.mxu0 %v5374_v0  ;;  %v964_v50 = vpop.f32.mrb[15].mxu1 }
 0x1d0   : > { %v5944_v52 = vadd.f32 %v964_v50, %v5923_v37 }
 0x1d1   : > { %4682 = vmatmul.mubr.msk.f32.vlgmr.msra.gmra.mrb[30].mxu1 %vm582_vm0, %v716_v47  ;;  %4687 = vmatmul.mubr.msk.f32.vlgmr.msra.gmra.mrb[32].mxu0 %vm582_vm0, %v945_v41 }
 0x1d2   : > { %4690 = vmatpush3.xpose.msk.msra.mxu1 %vm582_vm0, %v5715_v27  ;;  %4695 = vmatpush3.xpose.msk.msra.mxu0 %vm582_vm0, %v5718_v29  ;;  %v4634_v53 = vpop.f32.mrb[16].mxu0  ;;  %v968_v56 = vpop.f32.mrb[16].mxu1  ;;  %v963_v29 = vadd.f32 %v962_v49, %v5912_v32 }
 0x1d3   : > { %4691 = vmatprep.mubr.msk.f32.mxu1 %vm5375_vm1, %v5374_v0  ;;  %4696 = vmatprep.mubr.msk.f32.mxu0 %vm5375_vm1, %v5374_v0  ;;  %v5955_v60 = vadd.f32 %v4634_v53, %v5829_v57  ;;  %v1057_v61 = vpop.f32.mrb[17].mxu0  ;;  %v970_v27 = vpop.f32.mrb[17].mxu1  ;;  %v969_v3 = vadd.f32 %v968_v56, %v5912_v32 }
 0x1d4   : > { %4699 = vmatprep.subr.mxu1 %v5374_v0  ;;  %4704 = vmatprep.subr.mxu0 %v5374_v0  ;;  %v5960_v62 = vadd.f32 %v1057_v61, %v5829_v57  ;;  %v5967_v4 = vadd.f32 %v970_v27, %v5923_v37 }
 0x1d5   : > { %4692 = vmatmul.mubr.msk.f32.vlgmr.msra.gmra.mrb[32].mxu1 %vm582_vm0, %v951_v51  ;;  %4697 = vmatmul.mubr.msk.f32.vlgmr.msra.gmra.mrb[34].mxu0 %vm582_vm0, %v957_v19 }
 0x1d6   : > { %4700 = vmatpush3.xpose.msk.msra.mxu1 %vm582_vm0, %v5728_v36  ;;  %4705 = vmatpush3.xpose.msk.msra.mxu0 %vm582_vm0, %v5731_v40  ;;  %v4637_v8 = vpop.f32.mrb[18].mxu0  ;;  %v974_v9 = vpop.f32.mrb[18].mxu1 }
 0x1d7   : > { %4701 = vmatprep.mubr.msk.f32.mxu1 %vm5375_vm1, %v5374_v0  ;;  %4706 = vmatprep.mubr.msk.f32.mxu0 %vm5375_vm1, %v5374_v0  ;;  %v5978_v13 = vadd.f32 %v4637_v8, %v5829_v57  ;;  %v1067_v14 = vpop.f32.mrb[19].mxu0  ;;  %v976_v36 = vpop.f32.mrb[19].mxu1  ;;  %v975_v40 = vadd.f32 %v974_v9, %v5912_v32 }
 0x1d8   : > { %4709 = vmatprep.subr.mxu1 %v5374_v0  ;;  %4714 = vmatprep.subr.mxu0 %v5374_v0  ;;  %v5983_v18 = vadd.f32 %v1067_v14, %v5829_v57  ;;  %v5987_v20 = vadd.f32 %v976_v36, %v5923_v37 }
 0x1d9   : > { %4702 = vmatmul.mubr.msk.f32.vlgmr.msra.gmra.mrb[34].mxu1 %vm582_vm0, %v963_v29  ;;  %4707 = vmatmul.mubr.msk.f32.vlgmr.msra.gmra.mrb[36].mxu0 %vm582_vm0, %v969_v3 }
 0x1da   : > { %4710 = vmatpush3.xpose.msk.msra.mxu1 %vm582_vm0, %v5741_v42  ;;  %4715 = vmatpush3.xpose.msk.msra.mxu0 %vm582_vm0, %v5744_v43  ;;  %v4640_v22 = vpop.f32.mrb[20].mxu0  ;;  %v980_v24 = vpop.f32.mrb[20].mxu1 }
 0x1db   : > { %4711 = vmatprep.mubr.msk.f32.mxu1 %vm5375_vm1, %v5374_v0  ;;  %4716 = vmatprep.mubr.msk.f32.mxu0 %vm5375_vm1, %v5374_v0  ;;  %v6000_v25 = vadd.f32 %v4640_v22, %v5829_v57  ;;  %v1077_v28 = vpop.f32.mrb[21].mxu0  ;;  %v981_v33 = vadd.f32 %v980_v24, %v5912_v32  ;;  %v982_v42 = vpop.f32.mrb[21].mxu1 }
 0x1dc   : > { %4719 = vmatprep.subr.mxu1 %v5374_v0  ;;  %4724 = vmatprep.subr.mxu0 %v5374_v0  ;;  %v6006_v43 = vadd.f32 %v1077_v28, %v5829_v57  ;;  %v6011_v38 = vadd.f32 %v982_v42, %v5923_v37 }
 0x1dd   : > { %4712 = vmatmul.mubr.msk.f32.vlgmr.msra.gmra.mrb[36].mxu1 %vm582_vm0, %v975_v40  ;;  %4717 = vmatmul.mubr.msk.f32.vlgmr.msra.gmra.mrb[38].mxu0 %vm582_vm0, %v981_v33 }
 0x1de   : > { %4720 = vmatpush3.xpose.msk.msra.mxu1 %vm582_vm0, %v5755_v44  ;;  %v4643_v39 = vpop.f32.mrb[22].mxu0  ;;  %4725 = vmatpush3.msra.mxu0 %v947_v34  ;;  %v986_v41 = vpop.f32.mrb[22].mxu1  ;;  %v953_v44 = vadd.f32 %v5904_v30, %v5923_v37 }
 0x1df   : > { %4721 = vmatprep.mubr.msk.f32.mxu1 %vm5375_vm1, %v5374_v0  ;;  %v6020_v46 = vadd.f32 %v4643_v39, %v5829_v57  ;;  %v1087_v23 = vpop.f32.mrb[23].mxu0  ;;  %v987_v47 = vadd.f32 %v986_v41, %v5912_v32  ;;  %4729 = vmatprep.subr.mxu1 %v5374_v0  ;;  %v988_v49 = vpop.f32.mrb[23].mxu1 }
 0x1e0   : > { %v6025_v50 = vadd.f32 %v1087_v23, %v5829_v57  ;;  %4726 = vmatprep.mubr.msk.f32.mxu0 %vm5375_vm1, %v5374_v0  ;;  %v6032_v51 = vadd.f32 %v988_v49, %v5923_v37  ;;  %4734 = vmatprep.subr.mxu0 %v5374_v0 }
 0x1e1   : > { %4722 = vmatmul.mubr.msk.f32.vlgmr.msra.gmra.mrb[38].mxu1 %vm582_vm0, %v987_v47  ;;  %v6083_v47 = vrot.slane %v5837_v59, %v577_v55 }
 0x1e2   : > { %4730 = vmatpush3.msra.mxu1 %v953_v44  ;;  %4731 = vmatprep.mubr.msk.f32.mxu1 %vm5375_vm1, %v5374_v0 }
 0x1e3   : > { %4739 = vmatprep.subr.mxu1 %v5374_v0  ;;  %v787_v55 = vadd.f32 %v5848_v2, %v6083_v47  ;;  %v792_v2 = vadd.f32 %v5846_v1, %v6083_v47 }
 0x288   : > { %v1165_v57 = vpop.f32.mrb[24].mxu0 }
 0x289   : > { %4994 = vtanh.f32 %v1165_v57  ;;  %v4648_v32 = vpop.f32.mrb[25].mxu0 }
 0x28c   : > { %v1238_v30 = vpop.f32.mrb[24].mxu1 }
 0x28d   : > { %4996 = vtanh.f32 %v1238_v30  ;;  %v4653_v37 = vpop.f32.mrb[25].mxu1 }
 0x290   : > { %v1311_v19 = vpop.f32.mrb[26].mxu0 }
 0x291   : > { %4998 = vtanh.f32 %v1311_v19  ;;  %v4658_v53 = vpop.f32.mrb[27].mxu0 }
 0x293   : > { %v4995_v56 = vpop.eup %4994 }
 0x294   : > { %v4156_v61 = vsel %vm2280_vm2, %v4995_v56, 0.0  ;;  %v1384_v27 = vpop.f32.mrb[26].mxu1  ;;  %4727 = vmatmul.mubr.msk.f32.vlgmr.msra.gmra.mrb[40].mxu0 %vm2280_vm2, %v4995_v56 }
 0x295   : > { %4166 = vst [vmem:[%s6043_s17 + $0x10] sm:$0xff] %v4156_v61  ;;  %5000 = vtanh.f32 %v1384_v27  ;;  %4735 = vmatpush3.msra.mxu0 %v5929_v45  ;;  %v4663_v29 = vpop.f32.mrb[27].mxu1  ;;  %4736 = vmatprep.mubr.msk.f32.mxu0 %vm5375_vm1, %v5374_v0  ;;  %v797_v27 = vadd.f32 %v5860_v7, %v6083_v47  ;;  %v802_v7 = vadd.f32 %v5857_v6, %v6083_v47 }
 0x296   : > { %4744 = vmatprep.subr.mxu0 %v5374_v0 }
 0x297   : > { %v4997_v3 = vpop.eup %4996 }
 0x298   : > { %v4157_v8 = vsel %vm2280_vm2, %v4997_v3, 0.0  ;;  %v1457_v9 = vpop.f32.mrb[28].mxu0  ;;  %4732 = vmatmul.mubr.msk.f32.vlgmr.msra.gmra.mrb[40].mxu1 %vm2280_vm2, %v4997_v3 }
 0x299   : > { %4171 = vst [vmem:[%s6043_s17 + $0x38] sm:$0xff] %v4157_v8  ;;  %5002 = vtanh.f32 %v1457_v9  ;;  %4740 = vmatpush3.msra.mxu1 %v5944_v52  ;;  %v4668_v14 = vpop.f32.mrb[29].mxu0  ;;  %4741 = vmatprep.mubr.msk.f32.mxu1 %vm5375_vm1, %v5374_v0 }
 0x29a   : > { %4749 = vmatprep.subr.mxu1 %v5374_v0 }
 0x29b   : > { %v4999_v45 = vpop.eup %4998 }
 0x29c   : > { %v4158_v36 = vsel %vm2280_vm2, %v4999_v45, 0.0  ;;  %v1530_v40 = vpop.f32.mrb[28].mxu1  ;;  %4737 = vmatmul.mubr.msk.f32.vlgmr.msra.gmra.mrb[42].mxu0 %vm2280_vm2, %v4999_v45 }
 0x29d   : > { %4176 = vst [vmem:[%s6043_s17 + $0x60] sm:$0xff] %v4158_v36  ;;  %5004 = vtanh.f32 %v1530_v40  ;;  %4745 = vmatpush3.msra.mxu0 %v5967_v4  ;;  %v4673_v22 = vpop.f32.mrb[29].mxu1  ;;  %4746 = vmatprep.mubr.msk.f32.mxu0 %vm5375_vm1, %v5374_v0  ;;  %v807_v36 = vadd.f32 %v5872_v12, %v6083_v47 }
 0x29e   : > { %4754 = vmatprep.subr.mxu0 %v5374_v0 }
 0x29f   : > { %v5001_v52 = vpop.eup %5000 }
 0x2a0   : > { %v4159_v24 = vsel %vm2280_vm2, %v5001_v52, 0.0  ;;  %v1603_v28 = vpop.f32.mrb[30].mxu0  ;;  %4742 = vmatmul.mubr.msk.f32.vlgmr.msra.gmra.mrb[42].mxu1 %vm2280_vm2, %v5001_v52  ;;  %v812_v52 = vadd.f32 %v5869_v11, %v6083_v47 }
 0x2a1   : > { %4181 = vst [vmem:[%s6043_s17 + $0x88] sm:$0xff] %v4159_v24  ;;  %5006 = vtanh.f32 %v1603_v28  ;;  %4750 = vmatpush3.msra.mxu1 %v5987_v20  ;;  %v4678_v33 = vpop.f32.mrb[31].mxu0  ;;  %4751 = vmatprep.mubr.msk.f32.mxu1 %vm5375_vm1, %v5374_v0  ;;  %v817_v24 = vadd.f32 %v5884_v17, %v6083_v47  ;;  %v822_v28 = vadd.f32 %v5882_v16, %v6083_v47 }
 0x2a2   : > { %4759 = vmatprep.subr.mxu1 %v5374_v0  ;;  %v574_v16 = vrot.slane %v5837_v59, %v5907_v31 }
 0x2a3   : > { %v5003_v4 = vpop.eup %5002 }
 0x2a4   : > { %v4160_v42 = vsel %vm2280_vm2, %v5003_v4, 0.0  ;;  %v1676_v34 = vpop.f32.mrb[30].mxu1  ;;  %v1757_v39 = vpop.f32.mrb[32].mxu0  ;;  %4747 = vmatmul.mubr.msk.f32.vlgmr.msra.gmra.mrb[44].mxu0 %vm2280_vm2, %v5003_v4  ;;  %v676_v4 = vadd.f32 %v5844_v63, %v574_v16  ;;  %v700_v63 = vadd.f32 %v5891_v21, %v574_v16 }
 0x2a5   : > { %4186 = vst [vmem:[%s6043_s17 + $0xb0] sm:$0xff] %v4160_v42  ;;  %5008 = vtanh.f32 %v1676_v34  ;;  %4755 = vmatpush3.msra.mxu0 %v6011_v38  ;;  %v4683_v41 = vpop.f32.mrb[31].mxu1  ;;  %v4688_v20 = vpop.f32.mrb[33].mxu0  ;;  %4756 = vmatprep.mubr.msk.f32.mxu0 %vm5375_vm1, %v5374_v0 }
 0x2a6   : > { %5010 = vtanh.f32 %v1757_v39  ;;  %4764 = vmatprep.subr.mxu0 %v5374_v0  ;;  %v682_v41 = vadd.f32 %v5855_v5, %v574_v16  ;;  %v706_v5 = vadd.f32 %v5901_v26, %v574_v16 }
 0x2a7   : > { %v5005_v23 = vpop.eup %5004 }
 0x2a8   : > { %v4161_v49 = vsel %vm2280_vm2, %v5005_v23, 0.0  ;;  %v1830_v44 = vpop.f32.mrb[32].mxu1  ;;  %v1903_v57 = vpop.f32.mrb[34].mxu0  ;;  %4752 = vmatmul.mubr.msk.f32.vlgmr.msra.gmra.mrb[44].mxu1 %vm2280_vm2, %v5005_v23 }
 0x2a9   : > { %4191 = vst [vmem:[%s6043_s17 + $0xd8] sm:$0xff] %v4161_v49  ;;  %5012 = vtanh.f32 %v1830_v44  ;;  %4760 = vmatpush3.msra.mxu1 %v6032_v51  ;;  %v4693_v38 = vpop.f32.mrb[33].mxu1  ;;  %v4698_v32 = vpop.f32.mrb[35].mxu0  ;;  %4761 = vmatprep.mubr.msk.f32.mxu1 %vm5375_vm1, %v5374_v0  ;;  %v688_v49 = vadd.f32 %v5867_v10, %v574_v16  ;;  %v712_v10 = vadd.f32 %v5919_v35, %v574_v16 }
 0x2aa   : > { %5014 = vtanh.f32 %v1903_v57  ;;  %4769 = vmatprep.subr.mxu1 %v5374_v0  ;;  %v694_v32 = vadd.f32 %v5879_v15, %v574_v16  ;;  %v718_v15 = vadd.f32 %v5936_v48, %v574_v16  ;;  %v4437_v16 = vld [vmem:[%s6471_s0] ss:$0 sm:$0xff] }
 0x2ab   : > { %v5007_v54 = vpop.eup %5006 }
 0x2ac   : > { %v4162_v30 = vsel %vm2280_vm2, %v5007_v54, 0.0  ;;  %v1976_v37 = vpop.f32.mrb[34].mxu1  ;;  %v2049_v19 = vpop.f32.mrb[36].mxu0  ;;  %4757 = vmatmul.mubr.msk.f32.vlgmr.msra.gmra.mrb[46].mxu0 %vm2280_vm2, %v5007_v54 }
 0x2ad   : > { %4196 = vst [vmem:[%s6043_s17 + $0x100] sm:$0xff] %v4162_v30  ;;  %5016 = vtanh.f32 %v1976_v37  ;;  %4765 = vmatpush3.msra.mxu0 %v787_v55  ;;  %v4703_v51 = vpop.f32.mrb[35].mxu1  ;;  %v4708_v53 = vpop.f32.mrb[37].mxu0  ;;  %4766 = vmatprep.mubr.msk.f32.mxu0 %vm5375_vm1, %v5374_v0 }
 0x2ae   : > { %5018 = vtanh.f32 %v2049_v19  ;;  %4774 = vmatprep.subr.mxu0 %v5374_v0 }
 0x2af   : > { %v5009_v56 = vpop.eup %5008 }
 0x2b0   : > { %v5011_v61 = vpop.eup %5010  ;;  %v4163_v29 = vsel %vm2280_vm2, %v5009_v56, 0.0  ;;  %v2122_v3 = vpop.f32.mrb[36].mxu1  ;;  %4762 = vmatmul.mubr.msk.f32.vlgmr.msra.gmra.mrb[46].mxu1 %vm2280_vm2, %v5009_v56 }
 0x2b1   : > { %4201 = vst [vmem:[%s6043_s17 + $0x128] sm:$0xff] %v4163_v29  ;;  %5020 = vtanh.f32 %v2122_v3  ;;  %v2195_v8 = vpop.f32.mrb[38].mxu0  ;;  %4767 = vmatmul.mubr.msk.f32.vlgmr.msra.gmra.mrb[48].mxu0 %vm2280_vm2, %v5011_v61  ;;  %4770 = vmatpush3.msra.mxu1 %v792_v2  ;;  %v4713_v9 = vpop.f32.mrb[37].mxu1 }
 0x2b2   : > { %5022 = vtanh.f32 %v2195_v8  ;;  %4775 = vmatpush3.msra.mxu0 %v797_v27  ;;  %4771 = vmatprep.mubr.msk.f32.mxu1 %vm5375_vm1, %v5374_v0  ;;  %v4718_v1 = vpop.f32.mrb[39].mxu0 }
 0x2b3   : > { %v5013_v14 = vpop.eup %5012  ;;  %4776 = vmatprep.mubr.msk.f32.mxu0 %vm5375_vm1, %v5374_v0  ;;  %4779 = vmatprep.subr.mxu1 %v5374_v0 }
 0x2b4   : > { %v5015_v45 = vpop.eup %5014  ;;  %4784 = vmatprep.subr.mxu0 %v5374_v0  ;;  %4772 = vmatmul.mubr.msk.f32.vlgmr.msra.gmra.mrb[48].mxu1 %vm2280_vm2, %v5013_v14  ;;  %v2268_v40 = vpop.f32.mrb[38].mxu1 }
 0x2b5   : > { %4777 = vmatmul.mubr.msk.f32.vlgmr.msra.gmra.mrb[50].mxu0 %vm2280_vm2, %v5015_v45  ;;  %4780 = vmatpush3.msra.mxu1 %v802_v7  ;;  %5024 = vtanh.f32 %v2268_v40  ;;  %v4723_v6 = vpop.f32.mrb[39].mxu1 }
 0x2b6   : > { %4785 = vmatpush3.msra.mxu0 %v807_v36  ;;  %4781 = vmatprep.mubr.msk.f32.mxu1 %vm5375_vm1, %v5374_v0 }
 0x2b7   : > { %v5017_v22 = vpop.eup %5016  ;;  %4786 = vmatprep.mubr.msk.f32.mxu0 %vm5375_vm1, %v5374_v0  ;;  %4789 = vmatprep.subr.mxu1 %v5374_v0 }
 0x2b8   : > { %v5019_v12 = vpop.eup %5018  ;;  %4794 = vmatprep.subr.mxu0 %v5374_v0  ;;  %4782 = vmatmul.mubr.msk.f32.vlgmr.msra.gmra.mrb[50].mxu1 %vm2280_vm2, %v5017_v22 }
 0x2b9   : > { %4787 = vmatmul.mubr.msk.f32.vlgmr.msra.gmra.mrb[52].mxu0 %vm2280_vm2, %v5019_v12  ;;  %4790 = vmatpush3.msra.mxu1 %v812_v52 }
 0x2ba   : > { %4795 = vmatpush3.msra.mxu0 %v817_v24  ;;  %4791 = vmatprep.mubr.msk.f32.mxu1 %vm5375_vm1, %v5374_v0 }
 0x2bb   : > { %v5021_v11 = vpop.eup %5020  ;;  %4796 = vmatprep.mubr.msk.f32.mxu0 %vm5375_vm1, %v5374_v0  ;;  %4799 = vmatprep.subr.mxu1 %v5374_v0 }
 0x2bc   : > { %v5023_v17 = vpop.eup %5022  ;;  %4792 = vmatmul.mubr.msk.f32.vlgmr.msra.gmra.mrb[52].mxu1 %vm2280_vm2, %v5021_v11 }
 0x2bd   : > { %4797 = vmatmul.mubr.msk.f32.vlgmr.msra.gmra.mrb[54].mxu0 %vm2280_vm2, %v5023_v17  ;;  %4800 = vmatpush3.msra.mxu1 %v822_v28 }
 0x2be   : > { %4801 = vmatprep.mubr.msk.f32.mxu1 %vm5375_vm1, %v5374_v0 }
 0x2bf   : > { %v5025_v33 = vpop.eup %5024 }
 0x2c0   : > { %4802 = vmatmul.mubr.msk.f32.vlgmr.msra.gmra.mrb[54].mxu1 %vm2280_vm2, %v5025_v33 }
 0x2c1   : > { %4107 = vmatprep.mubr.f32.mxu1 %v5374_v0 }
 0x367   : > { %v2350_v42 = vpop.f32.mrb[40].mxu0 }
 0x368   : > { %v2865_v34 = vadd.f32 %v2350_v42, %v676_v4  ;;  %v4728_v39 = vpop.f32.mrb[41].mxu0 }
 0x36b   : > { %v2423_v20 = vpop.f32.mrb[40].mxu1 }
 0x36c   : > { %v2866_v23 = vadd.f32 %v2423_v20, %v682_v41  ;;  %v4733_v47 = vpop.f32.mrb[41].mxu1 }
 0x36f   : > { %v2496_v44 = vpop.f32.mrb[42].mxu0 }
 0x370   : > { %v2867_v57 = vadd.f32 %v2496_v44, %v688_v49  ;;  %v4738_v38 = vpop.f32.mrb[43].mxu0 }
 0x373   : > { %v2569_v54 = vpop.f32.mrb[42].mxu1 }
 0x374   : > { %v2868_v55 = vadd.f32 %v2569_v54, %v694_v32  ;;  %v4743_v59 = vpop.f32.mrb[43].mxu1 }
 0x377   : > { %v2642_v30 = vpop.f32.mrb[44].mxu0 }
 0x378   : > { %v2869_v37 = vadd.f32 %v2642_v30, %v700_v63  ;;  %v4748_v19 = vpop.f32.mrb[45].mxu0 }
 0x37b   : > { %v2715_v51 = vpop.f32.mrb[44].mxu1 }
 0x37c   : > { %v2870_v53 = vadd.f32 %v2715_v51, %v706_v5  ;;  %v4753_v56 = vpop.f32.mrb[45].mxu1 }
 0x37f   : > { %v2788_v2 = vpop.f32.mrb[46].mxu0 }
 0x380   : > { %v6154_v61 = vadd.f32 %v2788_v2, %v712_v10  ;;  %v4758_v27 = vpop.f32.mrb[47].mxu0 }
 0x383   : > { %v2861_v29 = vpop.f32.mrb[46].mxu1 }
 0x384   : > { %v6157_v3 = vadd.f32 %v2861_v29, %v718_v15  ;;  %v2950_v21 = vpop.f32.mrb[48].mxu0  ;;  %v4763_v8 = vpop.f32.mrb[47].mxu1  ;;  %v3863_v29 = vld [vmem:[#allocation9 + $0x80] sm:$0xff] }
 0x385   : > { %v3465_v9 = vadd.f32 %v2950_v21, %v5960_v62  ;;  %v4768_v1 = vpop.f32.mrb[49].mxu0  ;;  %v3847_v8 = vld [vmem:[#allocation9] sm:$0xff] }
 0x387   : > { %5026 = vtanh.f32 %v3465_v9  ;;  %v3023_v26 = vpop.f32.mrb[48].mxu1  ;;  %v3848_v9 = vld [vmem:[#allocation9 + $0x8] sm:$0xff] }
 0x388   : > { %v3466_v14 = vadd.f32 %v3023_v26, %v5955_v60  ;;  %v3096_v7 = vpop.f32.mrb[50].mxu0  ;;  %v4773_v35 = vpop.f32.mrb[49].mxu1  ;;  %5028 = vtanh.f32 %v2865_v34  ;;  %v6167_v60 = vld [vmem:[%s6470_s24] ss:$0 sm:$0xff]  ;;  %v4838_v1 = vpack.c.bf16 %v3848_v9, %v3847_v8  ;;  %v3865_v26 = vld [vmem:[#allocation9 + $0x90] sm:$0xff]  ;;  %v4012_v9 = vld [vmem:[#allocation10 + $0x68] sm:$0xff] }
 0x389   : > { %v3467_v45 = vadd.f32 %v3096_v7, %v5983_v18  ;;  %v4778_v36 = vpop.f32.mrb[51].mxu0  ;;  %v3849_v35 = vld [vmem:[#allocation9 + $0x10] sm:$0xff] }
 0x38a   : > { %5030 = vtanh.f32 %v3466_v14  ;;  %v3866_v14 = vld [vmem:[#allocation9 + $0x98] sm:$0xff]  ;;  %v4009_v8 = vld [vmem:[#allocation10 + $0x50] sm:$0xff] }
 0x38b   : > { %v3169_v48 = vpop.f32.mrb[50].mxu1  ;;  %5032 = vtanh.f32 %v2866_v23  ;;  %v4840_v7 = vpack.c.bf16 %v3866_v14, %v3865_v26 }
 0x38c   : > { %v3468_v40 = vadd.f32 %v3169_v48, %v5978_v13  ;;  %v3242_v6 = vpop.f32.mrb[52].mxu0  ;;  %v4783_v22 = vpop.f32.mrb[51].mxu1  ;;  %5034 = vtanh.f32 %v3467_v45  ;;  %v3850_v45 = vld [vmem:[#allocation9 + $0x18] sm:$0xff]  ;;  %v3867_v48 = vld [vmem:[#allocation9 + $0xa0] sm:$0xff] }
 0x38d   : > { %v3469_v62 = vadd.f32 %v3242_v6, %v6006_v43  ;;  %v4788_v52 = vpop.f32.mrb[53].mxu0  ;;  %5036 = vtanh.f32 %v2867_v57  ;;  %v4842_v36 = vpack.c.bf16 %v3850_v45, %v3849_v35  ;;  %v3851_v22 = vld [vmem:[#allocation9 + $0x20] sm:$0xff]  ;;  %v4013_v35 = vld [vmem:[#allocation10 + $0x70] sm:$0xff]  ;;  %v4016_v45 = vld [vmem:[#allocation10 + $0x88] sm:$0xff] }
 0x38e   : > { %5038 = vtanh.f32 %v3468_v40  ;;  %v3868_v40 = vld [vmem:[#allocation9 + $0xa8] sm:$0xff] }
 0x38f   : > { %v3315_v12 = vpop.f32.mrb[52].mxu1  ;;  %5040 = vtanh.f32 %v2868_v55  ;;  %v4844_v6 = vpack.c.bf16 %v3868_v40, %v3867_v48 }
 0x390   : > { %v3470_v18 = vadd.f32 %v3315_v12, %v6000_v25  ;;  %v3388_v24 = vpop.f32.mrb[54].mxu0  ;;  %v4793_v11 = vpop.f32.mrb[53].mxu1  ;;  %5042 = vtanh.f32 %v3469_v62  ;;  %v3852_v62 = vld [vmem:[#allocation9 + $0x28] sm:$0xff]  ;;  %v3869_v12 = vld [vmem:[#allocation9 + $0xb0] sm:$0xff] }
 0x391   : > { %v5027_v28 = vpop.eup %5026  ;;  %v3471_v13 = vadd.f32 %v3388_v24, %v6025_v50  ;;  %v4798_v17 = vpop.f32.mrb[55].mxu0  ;;  %5044 = vtanh.f32 %v2869_v37  ;;  %v4846_v52 = vpack.c.bf16 %v3852_v62, %v3851_v22  ;;  %v3853_v24 = vld [vmem:[#allocation9 + $0x30] sm:$0xff]  ;;  %v3854_v11 = vld [vmem:[#allocation9 + $0x38] sm:$0xff]  ;;  %v4020_v62 = vld [vmem:[#allocation10 + $0xa8] sm:$0xff] }
 0x392   : > { %v3519_v33 = vmul.f32 %v5027_v28, %v6167_v60  ;;  %v5029_v43 = vpop.eup %5028  ;;  %5046 = vtanh.f32 %v3470_v18  ;;  %v4850_v28 = vpack.c.bf16 %v3854_v11, %v3853_v24  ;;  %v3872_v17 = vld [vmem:[#allocation9 + $0xc8] sm:$0xff]  ;;  %v4017_v22 = vld [vmem:[#allocation10 + $0x90] sm:$0xff] }
 0x393   : > { %v3461_v42 = vpop.f32.mrb[54].mxu1  ;;  %v3488_v50 = vmul.f32 %v5029_v43, %v4437_v16  ;;  %5048 = vtanh.f32 %v2870_v53  ;;  %v3855_v43 = vld [vmem:[#allocation9 + $0x40] sm:$0xff]  ;;  %v4021_v24 = vld [vmem:[#allocation10 + $0xb0] sm:$0xff] }
 0x394   : > { %v5031_v4 = vpop.eup %5030  ;;  %3527 = vadd.xlane.f32.xlu0 %v3519_v33  ;;  %v3472_v25 = vadd.f32 %v3461_v42, %v6020_v46  ;;  %v4803_v39 = vpop.f32.mrb[55].mxu1  ;;  %5050 = vtanh.f32 %v3471_v13  ;;  %v3871_v13 = vld [vmem:[#allocation9 + $0xc0] sm:$0xff]  ;;  %v3873_v42 = vld [vmem:[#allocation9 + $0xd0] sm:$0xff] }
 0x395   : > { %v3520_v34 = vmul.f32 %v5031_v4, %v6167_v60  ;;  %v5033_v41 = vpop.eup %5032  ;;  %5052 = vtanh.f32 %v6154_v61  ;;  %v4852_v33 = vpack.c.bf16 %v3872_v17, %v3871_v13  ;;  %v3857_v39 = vld [vmem:[#allocation9 + $0x50] sm:$0xff] }
 0x396   : > { %v5035_v20 = vpop.eup %5034  ;;  %v3489_v23 = vmul.f32 %v5033_v41, %v4437_v16  ;;  %5054 = vtanh.f32 %v3472_v25  ;;  %v3874_v25 = vld [vmem:[#allocation9 + $0xd8] sm:$0xff] }
 0x397   : > { %3529 = vadd.xlane.f32.xlu1 %v3520_v34  ;;  %v5037_v47 = vpop.eup %5036  ;;  %v3521_v49 = vmul.f32 %v5035_v20, %v6167_v60  ;;  %5056 = vtanh.f32 %v6157_v3  ;;  %v3864_v3 = vld [vmem:[#allocation9 + $0x88] sm:$0xff]  ;;  %v4856_v34 = vpack.c.bf16 %v3874_v25, %v3873_v42  ;;  %v3858_v41 = vld [vmem:[#allocation9 + $0x58] sm:$0xff]  ;;  %v3875_v20 = vld [vmem:[#allocation9 + $0xe0] sm:$0xff] }
 0x398   : > { %3496 = vadd.xlane.f32.xlu0 %v3488_v50  ;;  %v5039_v44 = vpop.eup %5038  ;;  %v3490_v46 = vmul.f32 %v5037_v47, %v4437_v16  ;;  %v4836_v21 = vpack.c.bf16 %v3864_v3, %v3863_v29  ;;  %v4858_v50 = vpack.c.bf16 %v3858_v41, %v3857_v39 }
 0x399   : > { %v5041_v57 = vpop.eup %5040  ;;  %v3522_v38 = vmul.f32 %v5039_v44, %v6167_v60  ;;  %v3860_v44 = vld [vmem:[#allocation9 + $0x68] sm:$0xff] }
 0x39a   : > { %v5043_v32 = vpop.eup %5042  ;;  %v3491_v54 = vmul.f32 %v5041_v57, %v4437_v16  ;;  %4837 = vmatprep.subr.bf16.mxu0 %v4836_v21  ;;  %v4007_v21 = vld [vmem:[#allocation10 + $0x40] sm:$0xff] }
 0x39b   : > { %3498 = vadd.xlane.f32.xlu1 %v3489_v23  ;;  %v5045_v55 = vpop.eup %5044  ;;  %v3523_v59 = vmul.f32 %v5043_v32, %v6167_v60  ;;  %4839 = vmatpush3.bf16.msra.mxu0 %v4838_v1  ;;  %v3876_v23 = vld [vmem:[#allocation9 + $0xe8] sm:$0xff]  ;;  %v4014_v1 = vld [vmem:[#allocation10 + $0x78] sm:$0xff]  ;;  %v4878_v26 = vpack.c.bf16 %v4009_v8, %v4007_v21 }
 0x39c   : > { %3531 = vadd.xlane.f32.xlu0 %v3521_v49  ;;  %v5047_v63 = vpop.eup %5046  ;;  %v3492_v30 = vmul.f32 %v5045_v55, %v4437_v16  ;;  %4841 = vmatprep.subr.bf16.mxu0 %v4840_v7  ;;  %v4860_v47 = vpack.c.bf16 %v3876_v23, %v3875_v20  ;;  %v3859_v49 = vld [vmem:[#allocation9 + $0x60] sm:$0xff]  ;;  %v3862_v55 = vld [vmem:[#allocation9 + $0x78] sm:$0xff]  ;;  %v4880_v14 = vpack.c.bf16 %v4014_v1, %v4012_v9 }
 0x39d   : > { %v5049_v37 = vpop.eup %5048  ;;  %v3524_v19 = vmul.f32 %v5047_v63, %v6167_v60  ;;  %v4862_v57 = vpack.c.bf16 %v3860_v44, %v3859_v49  ;;  %v4000_v63 = vld [vmem:[#allocation10 + $0x8] sm:$0xff]  ;;  %v4011_v7 = vld [vmem:[#allocation10 + $0x60] sm:$0xff] }
 0x39e   : > { %v5051_v5 = vpop.eup %5050  ;;  %v3493_v51 = vmul.f32 %v5049_v37, %v4437_v16  ;;  %v3999_v37 = vld [vmem:[#allocation10] sm:$0xff]  ;;  %v4882_v48 = vpack.c.bf16 %v4013_v35, %v4011_v7 }
 0x39f   : > { %3500 = vadd.xlane.f32.xlu1 %v3490_v46  ;;  %v5053_v53 = vpop.eup %5052  ;;  %v3525_v56 = vmul.f32 %v5051_v5, %v6167_v60  ;;  %4843 = vmatpush3.bf16.msra.mxu0 %v4842_v36  ;;  %v3877_v46 = vld [vmem:[#allocation9 + $0xf0] sm:$0xff]  ;;  %v4018_v36 = vld [vmem:[#allocation10 + $0x98] sm:$0xff] }
 0x3a0   : > { %3533 = vadd.xlane.f32.xlu0 %v3522_v38  ;;  %v5055_v10 = vpop.eup %5054  ;;  %v3494_v2 = vmul.f32 %v5053_v53, %v4437_v16  ;;  %4845 = vmatprep.subr.bf16.mxu0 %v4844_v6  ;;  %v3878_v38 = vld [vmem:[#allocation9 + $0xf8] sm:$0xff]  ;;  %v4001_v5 = vld [vmem:[#allocation10 + $0x10] sm:$0xff]  ;;  %v4884_v40 = vpack.c.bf16 %v4018_v36, %v4016_v45  ;;  %v4015_v6 = vld [vmem:[#allocation10 + $0x80] sm:$0xff] }
 0x3a1   : > { %v5057_v61 = vpop.eup %5056  ;;  %v3526_v27 = vmul.f32 %v5055_v10, %v6167_v60  ;;  %v3870_v60 = vld [vmem:[#allocation9 + $0xb8] sm:$0xff]  ;;  %v4864_v32 = vpack.c.bf16 %v3878_v38, %v3877_v46 }
 0x3a2   : > { %v3495_v15 = vmul.f32 %v5057_v61, %v4437_v16  ;;  %v4848_v18 = vpack.c.bf16 %v3870_v60, %v3869_v12  ;;  %v3856_v16 = vld [vmem:[#allocation9 + $0x48] sm:$0xff]  ;;  %v4006_v53 = vld [vmem:[#allocation10 + $0x38] sm:$0xff]  ;;  %v4005_v61 = vld [vmem:[#allocation10 + $0x30] sm:$0xff]  ;;  %v4886_v12 = vpack.c.bf16 %v4017_v22, %v4015_v6 }
 0x3a3   : > { %3502 = vadd.xlane.f32.xlu1 %v3491_v54  ;;  %4847 = vmatpush3.bf16.msra.mxu0 %v4846_v52  ;;  %v4854_v4 = vpack.c.bf16 %v3856_v16, %v3855_v43  ;;  %v3861_v54 = vld [vmem:[#allocation9 + $0x70] sm:$0xff]  ;;  %v4022_v52 = vld [vmem:[#allocation10 + $0xb8] sm:$0xff] }
 0x3a4   : > { %3535 = vadd.xlane.f32.xlu0 %v3523_v59  ;;  %4849 = vmatprep.subr.bf16.mxu0 %v4848_v18  ;;  %v4866_v59 = vpack.c.bf16 %v3862_v55, %v3861_v54  ;;  %v4888_v60 = vpack.c.bf16 %v4022_v52, %v4020_v62  ;;  %v4019_v18 = vld [vmem:[#allocation10 + $0xa0] sm:$0xff] }
 0x3a5   : > { %v4890_v11 = vpack.c.bf16 %v4021_v24, %v4019_v18 }
 0x3a7   : > { %3504 = vadd.xlane.f32.xlu1 %v3492_v30  ;;  %4851 = vmatpush3.bf16.msra.mxu0 %v4850_v28  ;;  %v4002_v30 = vld [vmem:[#allocation10 + $0x18] sm:$0xff] }
 0x3a8   : > { %3537 = vadd.xlane.f32.xlu0 %v3524_v19  ;;  %4853 = vmatprep.subr.bf16.mxu0 %v4852_v33  ;;  %v4868_v19 = vpack.c.bf16 %v4002_v30, %v4000_v63 }
 0x3aa   : > { %4869 = vmatprep.subr.bf16.mxu1 %v4868_v19 }
 0x3ab   : > { %3506 = vadd.xlane.f32.xlu1 %v3493_v51  ;;  %4855 = vmatpush3.bf16.msra.mxu0 %v4854_v4  ;;  %v4004_v51 = vld [vmem:[#allocation10 + $0x28] sm:$0xff] }
 0x3ac   : > { %3539 = vadd.xlane.f32.xlu0 %v3525_v56  ;;  %4857 = vmatprep.subr.bf16.mxu0 %v4856_v34  ;;  %v4870_v56 = vpack.c.bf16 %v4001_v5, %v3999_v37  ;;  %v4872_v10 = vpack.c.bf16 %v4006_v53, %v4004_v51 }
 0x3ae   : > { %4871 = vmatpush1.bf16.msra.mxu1 %v4870_v56 }
 0x3af   : > { %3508 = vadd.xlane.f32.xlu1 %v3494_v2  ;;  %4859 = vmatpush3.bf16.msra.mxu0 %v4858_v50  ;;  %v4003_v2 = vld [vmem:[#allocation10 + $0x20] sm:$0xff] }
 0x3b0   : > { %3541 = vadd.xlane.f32.xlu0 %v3526_v27  ;;  %4861 = vmatprep.subr.bf16.mxu0 %v4860_v47  ;;  %v4008_v27 = vld [vmem:[#allocation10 + $0x48] sm:$0xff]  ;;  %v4874_v29 = vpack.c.bf16 %v4005_v61, %v4003_v2 }
 0x3b1   : > { %4873 = vmatprep.subr.bf16.mxu1 %v4872_v10 }
 0x3b2   : > { %4875 = vmatpush1.bf16.msra.mxu1 %v4874_v29 }
 0x3b3   : > { %3510 = vadd.xlane.f32.xlu1 %v3495_v15  ;;  %4863 = vmatpush3.bf16.msra.mxu0 %v4862_v57  ;;  %v4010_v15 = vld [vmem:[#allocation10 + $0x58] sm:$0xff] }
 0x3b4   : > { %4865 = vmatprep.subr.bf16.mxu0 %v4864_v32  ;;  %v4876_v3 = vpack.c.bf16 %v4010_v15, %v4008_v27 }
 0x3b6   : > { %4877 = vmatprep.subr.bf16.mxu1 %v4876_v3 }
 0x3b7   : > { %4867 = vmatpush3.bf16.msra.mxu0 %v4866_v59  ;;  %4879 = vmatpush1.bf16.msra.mxu1 %v4878_v26 }
 0x3b8   : > { %4881 = vmatprep.subr.bf16.mxu1 %v4880_v14 }
 0x3bb   : > { %4883 = vmatpush1.bf16.msra.mxu1 %v4882_v48 }
 0x3bc   : > { %4885 = vmatprep.subr.bf16.mxu1 %v4884_v40 }
 0x3bf   : > { %4887 = vmatpush1.bf16.msra.mxu1 %v4886_v12 }
 0x3c0   : > { %4889 = vmatprep.subr.bf16.mxu1 %v4888_v60 }
 0x3c3   : > { %4891 = vmatpush1.bf16.msra.mxu1 %v4890_v11 }
 0x421   : > { %v3528_v28 = vpop.xlane.xlu0 %3527 }
 0x422   : > { %v3679_v13 = vrot.slane %v3528_v28, 4 }
 0x424   : > { %v3680_v17 = vmax.f32 %v3528_v28, %v3679_v13  ;;  %v3530_v33 = vpop.xlane.xlu1 %3529 }
 0x425   : > { %v3685_v43 = vrot.slane %v3530_v33, 4  ;;  %v3497_v16 = vpop.xlane.xlu0 %3496 }
 0x426   : > { %v3681_v4 = vrot.slane %v3680_v17, 2  ;;  %v3543_v42 = vrot.slane %v3497_v16, 4 }
 0x427   : > { %v3686_v25 = vmax.f32 %v3530_v33, %v3685_v43 }
 0x428   : > { %v3682_v34 = vmax.f32 %v3680_v17, %v3681_v4  ;;  %v3544_v39 = vmax.f32 %v3497_v16, %v3543_v42  ;;  %v3499_v41 = vpop.xlane.xlu1 %3498 }
 0x429   : > { %v3687_v50 = vrot.slane %v3686_v25, 2  ;;  %v3549_v20 = vrot.slane %v3499_v41, 4  ;;  %v3532_v23 = vpop.xlane.xlu0 %3531 }
 0x42a   : > { %v3683_v47 = vrot.slane %v3682_v34, 1  ;;  %v3545_v49 = vrot.slane %v3544_v39, 2  ;;  %v3691_v44 = vrot.slane %v3532_v23, 4 }
 0x42b   : > { %v3688_v46 = vmax.f32 %v3686_v25, %v3687_v50  ;;  %v3550_v57 = vmax.f32 %v3499_v41, %v3549_v20 }
 0x42c   : > { %v3684_v38 = vmax.f32 %v3682_v34, %v3683_v47  ;;  %v3546_v32 = vmax.f32 %v3544_v39, %v3545_v49  ;;  %v3692_v54 = vmax.f32 %v3532_v23, %v3691_v44  ;;  %v3501_v55 = vpop.xlane.xlu1 %3500 }
 0x42d   : > { %v3689_v59 = vrot.slane %v3688_v46, 1  ;;  %v3551_v63 = vrot.slane %v3550_v57, 2  ;;  %v3555_v30 = vrot.slane %v3501_v55, 4  ;;  %v6185_v37 = vpop.xlane.xlu0 %3533 }
 0x42e   : > { %v3727_v19 = vsub.f32 %v3528_v28, %v3684_v38  ;;  %v3547_v5 = vrot.slane %v3546_v32, 1  ;;  %v3693_v51 = vrot.slane %v3692_v54, 2  ;;  %v3697_v53 = vrot.slane %v6185_v37, 4 }
 0x42f   : > { %v3690_v56 = vmax.f32 %v3688_v46, %v3689_v59  ;;  %v3552_v10 = vmax.f32 %v3550_v57, %v3551_v63  ;;  %v3556_v2 = vmax.f32 %v3501_v55, %v3555_v30 }
 0x430   : > { %v3735_v61 = vmul.f32 1.442695, %v3727_v19  ;;  %v3548_v27 = vmax.f32 %v3546_v32, %v3547_v5  ;;  %v3694_v15 = vmax.f32 %v3692_v54, %v3693_v51  ;;  %v3698_v29 = vmax.f32 %v6185_v37, %v3697_v53  ;;  %v6189_v3 = vpop.xlane.xlu1 %3502 }
 0x431   : > { %v3728_v21 = vsub.f32 %v3530_v33, %v3690_v56  ;;  %v3553_v8 = vrot.slane %v3552_v10, 1  ;;  %v3557_v9 = vrot.slane %v3556_v2, 2  ;;  %v3561_v1 = vrot.slane %v6189_v3, 4  ;;  %v6192_v26 = vpop.xlane.xlu0 %3535 }
 0x432   : > { %5058 = vpow2.f32 %v3735_v61  ;;  %v3591_v14 = vsub.f32 %v3497_v16, %v3548_v27  ;;  %v3695_v7 = vrot.slane %v3694_v15, 1  ;;  %v3699_v35 = vrot.slane %v3698_v29, 2 }
 0x433   : > { %v3737_v45 = vmul.f32 1.442695, %v3728_v21  ;;  %v3554_v36 = vmax.f32 %v3552_v10, %v3553_v8  ;;  %v3558_v48 = vmax.f32 %v3556_v2, %v3557_v9  ;;  %v3562_v40 = vmax.f32 %v6189_v3, %v3561_v1 }
 0x434   : > { %v3599_v6 = vmul.f32 1.442695, %v3591_v14  ;;  %v3696_v22 = vmax.f32 %v3694_v15, %v3695_v7  ;;  %v3700_v62 = vmax.f32 %v3698_v29, %v3699_v35  ;;  %v3703_v52 = vrot.slane %v6192_v26, 4  ;;  %v6196_v12 = vpop.xlane.xlu1 %3504 }
 0x435   : > { %5060 = vpow2.f32 %v3737_v45  ;;  %v3592_v60 = vsub.f32 %v3499_v41, %v3554_v36  ;;  %v3559_v18 = vrot.slane %v3558_v48, 1  ;;  %v3563_v24 = vrot.slane %v3562_v40, 2  ;;  %v6198_v11 = vpop.xlane.xlu0 %3537 }
 0x436   : > { %5062 = vpow2.f32 %v3599_v6  ;;  %v3729_v28 = vsub.f32 %v3532_v23, %v3696_v22  ;;  %v3701_v13 = vrot.slane %v3700_v62, 1  ;;  %v3704_v17 = vmax.f32 %v6192_v26, %v3703_v52 }
 0x437   : > { %v3601_v33 = vmul.f32 1.442695, %v3592_v60  ;;  %v3560_v43 = vmax.f32 %v3558_v48, %v3559_v18  ;;  %v3564_v16 = vmax.f32 %v3562_v40, %v3563_v24  ;;  %v3567_v4 = vrot.slane %v6196_v12, 4 }
 0x438   : > { %v3739_v42 = vmul.f32 1.442695, %v3729_v28  ;;  %v3702_v25 = vmax.f32 %v3700_v62, %v3701_v13  ;;  %v3705_v34 = vrot.slane %v3704_v17, 2  ;;  %v3709_v39 = vrot.slane %v6198_v11, 4  ;;  %v6203_v41 = vpop.xlane.xlu1 %3506 }
 0x439   : > { %5064 = vpow2.f32 %v3601_v33  ;;  %v3593_v50 = vsub.f32 %v3501_v55, %v3560_v43  ;;  %v3565_v20 = vrot.slane %v3564_v16, 1  ;;  %v3568_v23 = vmax.f32 %v6196_v12, %v3567_v4  ;;  %v6206_v47 = vpop.xlane.xlu0 %3539 }
 0x43a   : > { %5066 = vpow2.f32 %v3739_v42  ;;  %v3730_v49 = vsub.f32 %v6185_v37, %v3702_v25  ;;  %v3706_v44 = vmax.f32 %v3704_v17, %v3705_v34  ;;  %v3710_v46 = vmax.f32 %v6198_v11, %v3709_v39 }
 0x43b   : > { %v3603_v57 = vmul.f32 1.442695, %v3593_v50  ;;  %v3566_v38 = vmax.f32 %v3564_v16, %v3565_v20  ;;  %v3569_v32 = vrot.slane %v3568_v23, 2  ;;  %v3573_v54 = vrot.slane %v6203_v41, 4 }
 0x43c   : > { %v6211_v59 = vpop.eup %5058  ;;  %v3741_v63 = vmul.f32 1.442695, %v3730_v49  ;;  %v3707_v55 = vrot.slane %v3706_v44, 1  ;;  %v3711_v30 = vrot.slane %v3710_v46, 2  ;;  %v3715_v19 = vrot.slane %v6206_v47, 4  ;;  %v6214_v5 = vpop.xlane.xlu1 %3508 }
 0x43d   : > { %5068 = vpow2.f32 %v3603_v57  ;;  %v3594_v37 = vsub.f32 %v6189_v3, %v3566_v38  ;;  %v3570_v51 = vmax.f32 %v3568_v23, %v3569_v32  ;;  %v3574_v53 = vmax.f32 %v6203_v41, %v3573_v54  ;;  %v6218_v56 = vpop.xlane.xlu0 %3541 }
 0x43e   : > { %5070 = vpow2.f32 %v3741_v63  ;;  %v3708_v10 = vmax.f32 %v3706_v44, %v3707_v55  ;;  %v3712_v2 = vmax.f32 %v3710_v46, %v3711_v30  ;;  %v3716_v61 = vmax.f32 %v6206_v47, %v3715_v19 }
 0x43f   : > { %v6221_v27 = vpop.eup %5060  ;;  %v3605_v15 = vmul.f32 1.442695, %v3594_v37  ;;  %v3571_v29 = vrot.slane %v3570_v51, 1  ;;  %v3575_v21 = vrot.slane %v3574_v53, 2  ;;  %v3579_v8 = vrot.slane %v6214_v5, 4 }
 0x440   : > { %v6224_v9 = vpop.eup %5062  ;;  %v3731_v3 = vsub.f32 %v6192_v26, %v3708_v10  ;;  %v3713_v1 = vrot.slane %v3712_v2, 1  ;;  %v3717_v14 = vrot.slane %v3716_v61, 2  ;;  %v3721_v7 = vrot.slane %v6218_v56, 4  ;;  %v6230_v62 = vpop.xlane.xlu1 %3510 }
 0x441   : > { %v3615_v35 = vrot.slane %v6224_v9, 4  ;;  %5072 = vpow2.f32 %v3605_v15  ;;  %v3572_v45 = vmax.f32 %v3570_v51, %v3571_v29  ;;  %v3576_v36 = vmax.f32 %v3574_v53, %v3575_v21 }
 0x442   : > { %v3743_v48 = vmul.f32 1.442695, %v3731_v3  ;;  %v3714_v40 = vmax.f32 %v3712_v2, %v3713_v1  ;;  %v3718_v6 = vmax.f32 %v3716_v61, %v3717_v14  ;;  %v3580_v22 = vmax.f32 %v6214_v5, %v3579_v8 }
 0x443   : > { %v6232_v52 = vpop.eup %5064  ;;  %v3616_v26 = vadd.f32 %v6224_v9, %v3615_v35  ;;  %v3595_v60 = vsub.f32 %v6196_v12, %v3572_v45  ;;  %v3577_v18 = vrot.slane %v3576_v36, 1  ;;  %v3722_v24 = vmax.f32 %v6218_v56, %v3721_v7 }
 0x444   : > { %v6237_v28 = vpop.eup %5066  ;;  %5074 = vpow2.f32 %v3743_v48  ;;  %v3732_v13 = vsub.f32 %v6198_v11, %v3714_v40  ;;  %v3719_v17 = vrot.slane %v3718_v6, 1  ;;  %v3581_v33 = vrot.slane %v3580_v22, 2 }
 0x445   : > { %v3607_v43 = vmul.f32 1.442695, %v3595_v60  ;;  %v3578_v16 = vmax.f32 %v3576_v36, %v3577_v18  ;;  %v3723_v4 = vrot.slane %v3722_v24, 2  ;;  %v3585_v42 = vrot.slane %v6230_v62, 4 }
 0x446   : > { %v3745_v25 = vmul.f32 1.442695, %v3732_v13  ;;  %v3720_v34 = vmax.f32 %v3718_v6, %v3719_v17  ;;  %v3582_v39 = vmax.f32 %v3580_v22, %v3581_v33  ;;  %v3751_v12 = vrot.slane %v6211_v59, 4 }
 0x447   : > { %v6242_v50 = vpop.eup %5068  ;;  %5076 = vpow2.f32 %v3607_v43  ;;  %v3596_v20 = vsub.f32 %v6203_v41, %v3578_v16  ;;  %v3724_v23 = vmax.f32 %v3722_v24, %v3723_v4  ;;  %v3586_v11 = vmax.f32 %v6230_v62, %v3585_v42 }
 0x448   : > { %v6246_v49 = vpop.eup %5070  ;;  %5078 = vpow2.f32 %v3745_v25  ;;  %v3733_v44 = vsub.f32 %v6206_v47, %v3720_v34  ;;  %v3583_v46 = vrot.slane %v3582_v39, 1  ;;  %v3752_v57 = vadd.f32 %v6211_v59, %v3751_v12 }
 0x449   : > { %v3609_v38 = vmul.f32 1.442695, %v3596_v20  ;;  %v3725_v32 = vrot.slane %v3724_v23, 1  ;;  %v3587_v54 = vrot.slane %v3586_v11, 2  ;;  %v3617_v63 = vrot.slane %v3616_v26, 2 }
 0x44a   : > { %v3747_v55 = vmul.f32 1.442695, %v3733_v44  ;;  %v3584_v30 = vmax.f32 %v3582_v39, %v3583_v46  ;;  %v3753_v19 = vrot.slane %v3752_v57, 2  ;;  %v3757_v41 = vrot.slane %v6221_v27, 4 }
 0x44b   : > { %v6251_v37 = vpop.eup %5072  ;;  %5080 = vpow2.f32 %v3609_v38  ;;  %v3726_v51 = vmax.f32 %v3724_v23, %v3725_v32  ;;  %v3588_v53 = vmax.f32 %v3586_v11, %v3587_v54  ;;  %v3618_v10 = vadd.f32 %v3617_v63, %v3616_v26 }
 0x44c   : > { %5082 = vpow2.f32 %v3747_v55  ;;  %v3597_v47 = vsub.f32 %v6214_v5, %v3584_v30  ;;  %v3754_v2 = vadd.f32 %v3753_v19, %v3752_v57  ;;  %v3758_v61 = vadd.f32 %v6221_v27, %v3757_v41 }
 0x44d   : > { %v3734_v15 = vsub.f32 %v6218_v56, %v3726_v51  ;;  %v3589_v29 = vrot.slane %v3588_v53, 1  ;;  %v3619_v21 = vrot.slane %v3618_v10, 1  ;;  %v3621_v8 = vrot.slane %v6232_v52, 4 }
 0x44e   : > { %v6257_v3 = vpop.eup %5074  ;;  %v3611_v1 = vmul.f32 1.442695, %v3597_v47  ;;  %v3755_v14 = vrot.slane %v3754_v2, 1  ;;  %v3759_v7 = vrot.slane %v3758_v61, 2  ;;  %v3763_v35 = vrot.slane %v6237_v28, 4 }
 0x44f   : > { %v3749_v45 = vmul.f32 1.442695, %v3734_v15  ;;  %v3590_v36 = vmax.f32 %v3588_v53, %v3589_v29  ;;  %v3620_v48 = vadd.f32 %v3619_v21, %v3618_v10  ;;  %v3622_v5 = vadd.f32 %v6232_v52, %v3621_v8 }
 0x450   : > { %5084 = vpow2.f32 %v3611_v1  ;;  %v3756_v40 = vadd.f32 %v3755_v14, %v3754_v2  ;;  %v3760_v6 = vadd.f32 %v3759_v7, %v3758_v61  ;;  %v3764_v56 = vadd.f32 %v6237_v28, %v3763_v35 }
 0x451   : > { %v6262_v22 = vpop.eup %5076  ;;  %5086 = vpow2.f32 %v3749_v45  ;;  %v3598_v26 = vsub.f32 %v6230_v62, %v3590_v36  ;;  %v3623_v60 = vrot.slane %v3622_v5, 2  ;;  %v3627_v18 = vrot.slane %v6242_v50, 4 }
 0x452   : > { %v6266_v24 = vpop.eup %5078  ;;  %5088 = vrcp.f32 %v3756_v40  ;;  %v3761_v13 = vrot.slane %v3760_v6, 1  ;;  %v3765_v17 = vrot.slane %v3764_v56, 2  ;;  %v3769_v33 = vrot.slane %v6246_v49, 4 }
 0x453   : > { %v3613_v43 = vmul.f32 1.442695, %v3598_v26  ;;  %5090 = vrcp.f32 %v3620_v48  ;;  %v3624_v16 = vadd.f32 %v3623_v60, %v3622_v5  ;;  %v3628_v4 = vadd.f32 %v6242_v50, %v3627_v18 }
 0x454   : > { %v3762_v42 = vadd.f32 %v3761_v13, %v3760_v6  ;;  %v3766_v25 = vadd.f32 %v3765_v17, %v3764_v56  ;;  %v3770_v34 = vadd.f32 %v6246_v49, %v3769_v33  ;;  %v3633_v62 = vrot.slane %v6251_v37, 4  ;;  %v5122_v17 = vld [vmem:[%s5690_s21] sm:$0xff] }
 0x455   : > { %v6272_v39 = vpop.eup %5080  ;;  %5092 = vpow2.f32 %v3613_v43  ;;  %v3625_v12 = vrot.slane %v3624_v16, 1  ;;  %v3629_v20 = vrot.slane %v3628_v4, 2  ;;  %v3775_v23 = vrot.slane %v6257_v3, 4 }
 0x456   : > { %v6275_v11 = vpop.eup %5082  ;;  %5094 = vrcp.f32 %v3762_v42  ;;  %v3767_v44 = vrot.slane %v3766_v25, 1  ;;  %v3771_v46 = vrot.slane %v3770_v34, 2  ;;  %v3634_v57 = vadd.f32 %v6251_v37, %v3633_v62 }
 0x457   : > { %v3626_v38 = vadd.f32 %v3625_v12, %v3624_v16  ;;  %v3630_v32 = vadd.f32 %v3629_v20, %v3628_v4  ;;  %v3776_v54 = vadd.f32 %v6257_v3, %v3775_v23  ;;  %v3639_v63 = vrot.slane %v6262_v22, 4 }
 0x458   : > { %v3768_v55 = vadd.f32 %v3767_v44, %v3766_v25  ;;  %v3772_v30 = vadd.f32 %v3771_v46, %v3770_v34  ;;  %v3635_v19 = vrot.slane %v3634_v57, 2  ;;  %v3781_v41 = vrot.slane %v6266_v24, 4  ;;  %v5123_v25 = vld [vmem:[%s5683_s7] sm:$0xff] }
 0x459   : > { %5096 = vrcp.f32 %v3626_v38  ;;  %v3631_v51 = vrot.slane %v3630_v32, 1  ;;  %v3777_v53 = vrot.slane %v3776_v54, 2  ;;  %v3640_v10 = vadd.f32 %v6262_v22, %v3639_v63 }
 0x45a   : > { %v6282_v47 = vpop.eup %5084  ;;  %5098 = vrcp.f32 %v3768_v55  ;;  %v3773_v2 = vrot.slane %v3772_v30, 1  ;;  %v3636_v61 = vadd.f32 %v3635_v19, %v3634_v57  ;;  %v3782_v15 = vadd.f32 %v6266_v24, %v3781_v41 }
 0x45b   : > { %v6285_v29 = vpop.eup %5086  ;;  %v3632_v21 = vadd.f32 %v3631_v51, %v3630_v32  ;;  %v3778_v8 = vadd.f32 %v3777_v53, %v3776_v54  ;;  %v3641_v1 = vrot.slane %v3640_v10, 2  ;;  %v3645_v14 = vrot.slane %v6272_v39, 4  ;;  %v5124_v32 = vld [vmem:[%s5690_s21 + $0x8] sm:$0xff] }
 0x45c   : > { %v5089_v7 = vpop.eup %5088  ;;  %v3774_v35 = vadd.f32 %v3773_v2, %v3772_v30  ;;  %v3637_v45 = vrot.slane %v3636_v61, 1  ;;  %v3783_v36 = vrot.slane %v3782_v15, 2  ;;  %v3787_v48 = vrot.slane %v6275_v11, 4 }
 0x45d   : > { %v5091_v5 = vpop.eup %5090  ;;  %v3800_v40 = vmul.f32 %v5089_v7, %v6211_v59  ;;  %5100 = vrcp.f32 %v3632_v21  ;;  %v3779_v6 = vrot.slane %v3778_v8, 1  ;;  %v3642_v56 = vadd.f32 %v3641_v1, %v3640_v10 }
 0x45e   : > { %v3664_v26 = vmul.f32 %v5091_v5, %v6224_v9  ;;  %5102 = vrcp.f32 %v3774_v35  ;;  %v3638_v60 = vadd.f32 %v3637_v45, %v3636_v61  ;;  %v3784_v18 = vadd.f32 %v3783_v36, %v3782_v15  ;;  %v5125_v61 = vld [vmem:[%s5683_s7 + $0x8] sm:$0xff] }
 0x45f   : > { %v6291_v13 = vpop.eup %5092  ;;  %v3823_v33 = vmul.f32 %v5122_v17, %v3800_v40  ;;  %v3780_v43 = vadd.f32 %v3779_v6, %v3778_v8  ;;  %v3643_v16 = vrot.slane %v3642_v56, 1  ;;  %v3646_v4 = vadd.f32 %v6272_v39, %v3645_v14  ;;  %v5126_v14 = vld [vmem:[%s5690_s21 + $0x10] sm:$0xff] }
 0x460   : > { %v5095_v42 = vpop.eup %5094  ;;  %v3815_v59 = vmul.f32 %v5123_v25, %v3664_v26  ;;  %5104 = vrcp.f32 %v3638_v60  ;;  %v3785_v34 = vrot.slane %v3784_v18, 1  ;;  %v3788_v9 = vadd.f32 %v6275_v11, %v3787_v48  ;;  %v5127_v17 = vld [vmem:[%s5683_s7 + $0x10] sm:$0xff] }
 0x461   : > { %v3839_v62 = vsel %vm582_vm0, %v3823_v33, 0.0  ;;  %4440 = vmatprep.mubr.msk.f32.mxu0 %vm582_vm0, %v3823_v33  ;;  %v3802_v12 = vmul.f32 %v5095_v42, %v6221_v27  ;;  %5106 = vrcp.f32 %v3780_v43  ;;  %v3644_v20 = vadd.f32 %v3643_v16, %v3642_v56  ;;  %v5128_v16 = vld [vmem:[%s5690_s21 + $0x18] sm:$0xff] }
 0x462   : > { %4165 = vst [vmem:[%s6043_s17 + $0x8] sm:$0xff] %v3839_v62  ;;  %v3831_v23 = vsel %vm582_vm0, %v3815_v59, 0.0  ;;  %4441 = vmatmul.mubr.msk.f32.vlgmr.msra.gmra.mrb[56].mxu0 %vm582_vm0, %v3815_v59  ;;  %v3786_v44 = vadd.f32 %v3785_v34, %v3784_v18  ;;  %v3647_v46 = vrot.slane %v3646_v4, 2  ;;  %v3789_v57 = vrot.slane %v3788_v9, 2 }
 0x463   : > { %v5097_v38 = vpop.eup %5096  ;;  %4164 = vst [vmem:[%s6043_s17] sm:$0xff] %v3831_v23  ;;  %v3824_v54 = vmul.f32 %v5124_v32, %v3802_v12  ;;  %5108 = vrcp.f32 %v3644_v20  ;;  %v3651_v63 = vrot.slane %v6282_v47, 4  ;;  %v3793_v27 = vrot.slane %v6285_v29, 4 }
 0x464   : > { %v5099_v55 = vpop.eup %5098  ;;  %v3666_v30 = vmul.f32 %v5097_v38, %v6232_v52  ;;  %5110 = vrcp.f32 %v3786_v44  ;;  %v3648_v19 = vadd.f32 %v3647_v46, %v3646_v4  ;;  %v3790_v41 = vadd.f32 %v3789_v57, %v3788_v9  ;;  %v5130_v46 = vld [vmem:[%s5690_s21 + $0x20] sm:$0xff] }
 0x465   : > { %v3840_v51 = vsel %vm582_vm0, %v3824_v54, 0.0  ;;  %4442 = vmatprep.mubr.msk.f32.mxu0 %vm582_vm0, %v3824_v54  ;;  %v3804_v53 = vmul.f32 %v5099_v55, %v6237_v28  ;;  %v3652_v10 = vadd.f32 %v6282_v47, %v3651_v63  ;;  %v3794_v2 = vadd.f32 %v6285_v29, %v3793_v27  ;;  %v5131_v55 = vld [vmem:[%s5683_s7 + $0x20] sm:$0xff] }
 0x466   : > { %4170 = vst [vmem:[%s6043_s17 + $0x30] sm:$0xff] %v3840_v51  ;;  %v3816_v15 = vmul.f32 %v5125_v61, %v3666_v30  ;;  %v3649_v21 = vrot.slane %v3648_v19, 1  ;;  %v3791_v52 = vrot.slane %v3790_v41, 1  ;;  %v3657_v8 = vrot.slane %v6291_v13, 4 }
 0x467   : > { %v5101_v1 = vpop.eup %5100  ;;  %v3825_v7 = vmul.f32 %v5126_v14, %v3804_v53  ;;  %v3653_v35 = vrot.slane %v3652_v10, 2  ;;  %v3795_v45 = vrot.slane %v3794_v2, 2 }
 0x468   : > { %v5103_v28 = vpop.eup %5102  ;;  %v3832_v36 = vsel %vm582_vm0, %v3816_v15, 0.0  ;;  %4443 = vmatmul.mubr.msk.f32.gmra.mrb[58].mxu0 %vm582_vm0, %v3816_v15  ;;  %v3668_v48 = vmul.f32 %v5101_v1, %v6242_v50  ;;  %v3650_v5 = vadd.f32 %v3649_v21, %v3648_v19  ;;  %v3792_v40 = vadd.f32 %v3791_v52, %v3790_v41  ;;  %v5133_v21 = vld [vmem:[%s5683_s7 + $0x28] sm:$0xff] }
 0x469   : > { %4169 = vst [vmem:[%s6043_s17 + $0x28] sm:$0xff] %v3832_v36  ;;  %v3841_v6 = vsel %vm582_vm0, %v3825_v7, 0.0  ;;  %4444 = vmatprep.mubr.msk.f32.mxu0 %vm582_vm0, %v3825_v7  ;;  %v3806_v56 = vmul.f32 %v5103_v28, %v6246_v49  ;;  %v3654_v26 = vadd.f32 %v3653_v35, %v3652_v10  ;;  %v3796_v60 = vadd.f32 %v3795_v45, %v3794_v2  ;;  %v5135_v28 = vld [vmem:[%s5683_s7 + $0x30] sm:$0xff] }
 0x46a   : > { %v5105_v18 = vpop.eup %5104  ;;  %4175 = vst [vmem:[%s6043_s17 + $0x58] sm:$0xff] %v3841_v6  ;;  %v3817_v33 = vmul.f32 %v5127_v17, %v3668_v48  ;;  %5112 = vrcp.f32 %v3650_v5  ;;  %v3658_v50 = vadd.f32 %v6291_v13, %v3657_v8  ;;  %v5134_v8 = vld [vmem:[%s5690_s21 + $0x30] sm:$0xff]  ;;  %v5136_v48 = vld [vmem:[%s5690_s21 + $0x38] sm:$0xff] }
 0x46b   : > { %v5107_v43 = vpop.eup %5106  ;;  %v3826_v4 = vmul.f32 %v5128_v16, %v3806_v56  ;;  %v3670_v42 = vmul.f32 %v5105_v18, %v6251_v37  ;;  %5114 = vrcp.f32 %v3792_v40  ;;  %v3655_v49 = vrot.slane %v3654_v26, 1  ;;  %v5129_v37 = vld [vmem:[%s5683_s7 + $0x18] sm:$0xff]  ;;  %v4024_v18 = vld [vmem:[#allocation10 + $0xc8] sm:$0xff] }
 0x46c   : > { %v3833_v25 = vsel %vm582_vm0, %v3817_v33, 0.0  ;;  %4445 = vmatmul.mubr.msk.f32.gmra.mrb[60].mxu0 %vm582_vm0, %v3817_v33  ;;  %v3808_v59 = vmul.f32 %v5107_v43, %v6257_v3  ;;  %v3797_v34 = vrot.slane %v3796_v60, 1  ;;  %v3659_v9 = vrot.slane %v3658_v50, 2  ;;  %v4026_v17 = vld [vmem:[#allocation10 + $0xd8] sm:$0xff]  ;;  %v4025_v43 = vld [vmem:[#allocation10 + $0xd0] sm:$0xff] }
 0x46d   : > { %v5109_v62 = vpop.eup %5108  ;;  %4174 = vst [vmem:[%s6043_s17 + $0x50] sm:$0xff] %v3833_v25  ;;  %v3842_v12 = vsel %vm582_vm0, %v3826_v4, 0.0  ;;  %4446 = vmatprep.mubr.msk.f32.mxu0 %vm582_vm0, %v3826_v4  ;;  %v3818_v20 = vmul.f32 %v5129_v37, %v3670_v42  ;;  %v3656_v23 = vadd.f32 %v3655_v49, %v3654_v26  ;;  %v5137_v26 = vld [vmem:[%s5683_s7 + $0x38] sm:$0xff]  ;;  %v4892_v33 = vpack.c.bf16 %v4026_v17, %v4024_v18  ;;  %v4028_v4 = vld [vmem:[#allocation10 + $0xe8] sm:$0xff]  ;;  %v4029_v25 = vld [vmem:[#allocation10 + $0xf0] sm:$0xff] }
 0x46e   : > { %v5111_v44 = vpop.eup %5110  ;;  %4180 = vst [vmem:[%s6043_s17 + $0x80] sm:$0xff] %v3842_v12  ;;  %v3827_v57 = vmul.f32 %v5130_v46, %v3808_v59  ;;  %v3672_v3 = vmul.f32 %v5109_v62, %v6262_v22  ;;  %v3798_v38 = vadd.f32 %v3797_v34, %v3796_v60  ;;  %v3660_v32 = vadd.f32 %v3659_v9, %v3658_v50  ;;  %v5132_v22 = vld [vmem:[%s5690_s21 + $0x28] sm:$0xff]  ;;  %v4023_v50 = vld [vmem:[#allocation10 + $0xc0] sm:$0xff]  ;;  %v4030_v42 = vld [vmem:[#allocation10 + $0xf8] sm:$0xff] }
 0x46f   : > { %v3834_v54 = vsel %vm582_vm0, %v3818_v20, 0.0  ;;  %v3810_v63 = vmul.f32 %v5111_v44, %v6266_v24  ;;  %5116 = vrcp.f32 %v3656_v23  ;;  %4893 = vmatprep.subr.bf16.mxu1 %v4892_v33  ;;  %v4894_v16 = vpack.c.bf16 %v4025_v43, %v4023_v50  ;;  %v4439_v9 = vld [vmem:[%s6472_s30] ss:$0 sm:$0xff] }
 0x470   : > { %4447 = vmatmul.mubr.msk.f32.gmra.mrb[62].mxu0 %vm582_vm0, %v3818_v20  ;;  %4179 = vst [vmem:[%s6043_s17 + $0x78] sm:$0xff] %v3834_v54  ;;  %v3843_v27 = vsel %vm582_vm0, %v3827_v57, 0.0  ;;  %v3819_v30 = vmul.f32 %v5131_v55, %v3672_v3  ;;  %5118 = vrcp.f32 %v3798_v38  ;;  %v3661_v19 = vrot.slane %v3660_v32, 1 }
 0x471   : > { %4448 = vmatprep.mubr.msk.f32.mxu0 %vm582_vm0, %v3827_v57  ;;  %4185 = vst [vmem:[%s6043_s17 + $0xa8] sm:$0xff] %v3843_v27  ;;  %v3828_v41 = vmul.f32 %v5132_v22, %v3810_v63  ;;  %4895 = vmatpush1.bf16.msra.mxu1 %v4894_v16  ;;  %v4896_v49 = vpack.c.bf16 %v4030_v42, %v4028_v4 }
 0x472   : > { %v3835_v24 = vsel %vm582_vm0, %v3819_v30, 0.0  ;;  %v3662_v51 = vadd.f32 %v3661_v19, %v3660_v32 }
 0x473   : > { %4184 = vst [vmem:[%s6043_s17 + $0xa0] sm:$0xff] %v3835_v24  ;;  %v3844_v53 = vsel %vm582_vm0, %v3828_v41, 0.0  ;;  %4897 = vmatprep.subr.bf16.mxu1 %v4896_v49 }
 0x474   : > { %v5113_v10 = vpop.eup %5112  ;;  %4449 = vmatmul.mubr.msk.f32.gmra.mrb[64].mxu0 %vm582_vm0, %v3819_v30  ;;  %4190 = vst [vmem:[%s6043_s17 + $0xd0] sm:$0xff] %v3844_v53  ;;  %5120 = vrcp.f32 %v3662_v51 }
 0x475   : > { %v5115_v2 = vpop.eup %5114  ;;  %4450 = vmatprep.mubr.msk.f32.mxu0 %vm582_vm0, %v3828_v41  ;;  %v3674_v61 = vmul.f32 %v5113_v10, %v6272_v39 }
 0x476   : > { %v3812_v15 = vmul.f32 %v5115_v2, %v6275_v11 }
 0x477   : > { %v3820_v52 = vmul.f32 %v5133_v21, %v3674_v61 }
 0x478   : > { %v3829_v1 = vmul.f32 %v5134_v8, %v3812_v15 }
 0x479   : > { %v5117_v14 = vpop.eup %5116  ;;  %v3836_v7 = vsel %vm582_vm0, %v3820_v52, 0.0  ;;  %4451 = vmatmul.mubr.msk.f32.gmra.mrb[66].mxu0 %vm582_vm0, %v3820_v52 }
 0x47a   : > { %v5119_v35 = vpop.eup %5118  ;;  %4189 = vst [vmem:[%s6043_s17 + $0xc8] sm:$0xff] %v3836_v7  ;;  %v3845_v45 = vsel %vm582_vm0, %v3829_v1, 0.0  ;;  %4452 = vmatprep.mubr.msk.f32.mxu0 %vm582_vm0, %v3829_v1  ;;  %v3676_v39 = vmul.f32 %v5117_v14, %v6282_v47 }
 0x47b   : > { %4195 = vst [vmem:[%s6043_s17 + $0xf8] sm:$0xff] %v3845_v45  ;;  %v3814_v11 = vmul.f32 %v5119_v35, %v6285_v29 }
 0x47c   : > { %v3821_v36 = vmul.f32 %v5135_v28, %v3676_v39 }
 0x47d   : > { %v3830_v5 = vmul.f32 %v5136_v48, %v3814_v11 }
 0x47e   : > { %v5121_v40 = vpop.eup %5120  ;;  %v3837_v6 = vsel %vm582_vm0, %v3821_v36, 0.0  ;;  %4453 = vmatmul.mubr.msk.f32.gmra.mrb[68].mxu0 %vm582_vm0, %v3821_v36 }
 0x47f   : > { %4194 = vst [vmem:[%s6043_s17 + $0xf0] sm:$0xff] %v3837_v6  ;;  %v3846_v56 = vsel %vm582_vm0, %v3830_v5, 0.0  ;;  %4454 = vmatprep.mubr.msk.f32.mxu0 %vm582_vm0, %v3830_v5  ;;  %v3678_v47 = vmul.f32 %v5121_v40, %v6291_v13  ;;  %v4027_v13 = vld [vmem:[#allocation10 + $0xe0] sm:$0xff] }
 0x480   : > { %4200 = vst [vmem:[%s6043_s17 + $0x120] sm:$0xff] %v3846_v56  ;;  %v4898_v59 = vpack.c.bf16 %v4029_v25, %v4027_v13  ;;  %v4031_v5 = vld [vmem:[%s6473_s16] sm:$0x3] }
 0x481   : > { %v3822_v29 = vmul.f32 %v5137_v26, %v3678_v47  ;;  %v4036_v40 = vrot.slane %v4031_v5, %v5832_v58  ;;  %v4040_v6 = vrot.slane %v4031_v5, %v5907_v31 }
 0x482   : > { %4899 = vmatpush1.bf16.msra.mxu1 %v4898_v59 }
 0x483   : > { %v3838_v60 = vsel %vm582_vm0, %v3822_v29, 0.0  ;;  %4455 = vmatmul.mubr.msk.f32.gmra.mrb[70].mxu0 %vm582_vm0, %v3822_v29 }
 0x484   : > { %4199 = vst [vmem:[%s6043_s17 + $0x118] sm:$0xff] %v3838_v60 }
 0x535   : > { %v4580_v34 = vpop.f32.mrb[56].mxu0 }
 0x536   : > { %v4581_v62 = vpop.f32.mrb[57].mxu0 }
 0x537   : > { %v4582_v12 = vadd.f32 %v4581_v62, %v4580_v34 }
 0x539   : > { %v3953_v37 = vadd.f32 %v4582_v12, %v4439_v9 }
 0x53b   : > { %v3991_v20 = vmax.f32 %v3953_v37, 0.0  ;;  %v4583_v23 = vpop.f32.mrb[58].mxu0 }
 0x53c   : > { %v4584_v44 = vpop.f32.mrb[59].mxu0 }
 0x53d   : > { %v4585_v46 = vadd.f32 %v4584_v44, %v4583_v23  ;;  %4108 = vmatmul.mubr.f32.vlgmr.msra.gmra.mrb[56].mxu1 %v3991_v20 }
 0x53e   : > { %4113 = vmatprep.mubr.f32.mxu1 %v5374_v0 }
 0x53f   : > { %v3958_v57 = vadd.f32 %v4585_v46, %v4439_v9  ;;  %v4586_v3 = vpop.f32.mrb[60].mxu0 }
 0x540   : > { %v4587_v38 = vpop.f32.mrb[61].mxu0 }
 0x541   : > { %v3992_v32 = vmax.f32 %v3958_v57, 0.0  ;;  %v4588_v54 = vadd.f32 %v4587_v38, %v4586_v3 }
 0x543   : > { %v3963_v63 = vadd.f32 %v4588_v54, %v4439_v9  ;;  %v4589_v27 = vpop.f32.mrb[62].mxu0  ;;  %4114 = vmatmul.mubr.f32.gmra.mrb[58].mxu1 %v3992_v32 }
 0x544   : > { %v4590_v55 = vpop.f32.mrb[63].mxu0  ;;  %4119 = vmatprep.mubr.f32.mxu1 %v5374_v0 }
 0x545   : > { %v3993_v30 = vmax.f32 %v3963_v63, 0.0  ;;  %v4591_v19 = vadd.f32 %v4590_v55, %v4589_v27 }
 0x547   : > { %v3968_v22 = vadd.f32 %v4591_v19, %v4439_v9  ;;  %v4592_v41 = vpop.f32.mrb[64].mxu0  ;;  %4120 = vmatmul.mubr.f32.gmra.mrb[60].mxu1 %v3993_v30 }
 0x548   : > { %v4593_v24 = vpop.f32.mrb[65].mxu0  ;;  %4125 = vmatprep.mubr.f32.mxu1 %v5374_v0 }
 0x549   : > { %v3994_v51 = vmax.f32 %v3968_v22, 0.0  ;;  %v4594_v53 = vadd.f32 %v4593_v24, %v4592_v41 }
 0x54b   : > { %v3973_v10 = vadd.f32 %v4594_v53, %v4439_v9  ;;  %4126 = vmatmul.mubr.f32.gmra.mrb[62].mxu1 %v3994_v51 }
 0x54c   : > { %v4595_v2 = vpop.f32.mrb[66].mxu0  ;;  %4131 = vmatprep.mubr.f32.mxu1 %v5374_v0 }
 0x54d   : > { %v3995_v61 = vmax.f32 %v3973_v10, 0.0  ;;  %v4596_v15 = vpop.f32.mrb[67].mxu0 }
 0x54e   : > { %v4597_v21 = vadd.f32 %v4596_v15, %v4595_v2 }
 0x54f   : > { %4132 = vmatmul.mubr.f32.gmra.mrb[64].mxu1 %v3995_v61 }
 0x550   : > { %v3978_v52 = vadd.f32 %v4597_v21, %v4439_v9  ;;  %4137 = vmatprep.mubr.f32.mxu1 %v5374_v0 }
 0x551   : > { %v4598_v8 = vpop.f32.mrb[68].mxu0 }
 0x552   : > { %v3996_v1 = vmax.f32 %v3978_v52, 0.0  ;;  %v4599_v14 = vpop.f32.mrb[69].mxu0 }
 0x553   : > { %v4600_v7 = vadd.f32 %v4599_v14, %v4598_v8 }
 0x554   : > { %4138 = vmatmul.mubr.f32.gmra.mrb[66].mxu1 %v3996_v1 }
 0x555   : > { %v3983_v35 = vadd.f32 %v4600_v7, %v4439_v9  ;;  %4143 = vmatprep.mubr.f32.mxu1 %v5374_v0 }
 0x556   : > { %v4601_v45 = vpop.f32.mrb[70].mxu0 }
 0x557   : > { %v3997_v39 = vmax.f32 %v3983_v35, 0.0  ;;  %v4602_v11 = vpop.f32.mrb[71].mxu0 }
 0x558   : > { %v4603_v28 = vadd.f32 %v4602_v11, %v4601_v45 }
 0x559   : > { %4144 = vmatmul.mubr.f32.gmra.mrb[68].mxu1 %v3997_v39 }
 0x55a   : > { %v3988_v36 = vadd.f32 %v4603_v28, %v4439_v9  ;;  %4149 = vmatprep.mubr.f32.mxu1 %v5374_v0 }
 0x55c   : > { %v3998_v48 = vmax.f32 %v3988_v36, 0.0 }
 0x55e   : > { %4150 = vmatmul.mubr.f32.gmra.mrb[70].mxu1 %v3998_v48 }
 0x610   : > { %v4109_v56 = vpop.f32.mrb[56].mxu1 }
 0x611   : > { %v4110_v47 = vadd.f32 %v4109_v56, %v4036_v40  ;;  %v4111_v26 = vpop.f32.mrb[57].mxu1 }
 0x612   : > { %v4112_v29 = vadd.f32 %v4111_v26, %v4040_v6 }
 0x613   : > { %4167 = vst [vmem:[%s6043_s17 + $0x18] sm:$0xff] %v4110_v47 }
 0x614   : > { %4168 = vst [vmem:[%s6043_s17 + $0x20] sm:$0xff] %v4112_v29 }
 0x616   : > { %v4115_v0 = vpop.f32.mrb[58].mxu1 }
 0x617   : > { %v4116_v60 = vadd.f32 %v4115_v0, %v4036_v40  ;;  %v4117_v18 = vpop.f32.mrb[59].mxu1 }
 0x618   : > { %v4118_v17 = vadd.f32 %v4117_v18, %v4040_v6 }
 0x619   : > { %4172 = vst [vmem:[%s6043_s17 + $0x40] sm:$0xff] %v4116_v60 }
 0x61a   : > { %4173 = vst [vmem:[%s6043_s17 + $0x48] sm:$0xff] %v4118_v17  ;;  %v4121_v33 = vpop.f32.mrb[60].mxu1 }
 0x61b   : > { %v4122_v58 = vadd.f32 %v4121_v33, %v4036_v40  ;;  %v4123_v31 = vpop.f32.mrb[61].mxu1 }
 0x61c   : > { %v4124_v50 = vadd.f32 %v4123_v31, %v4040_v6 }
 0x61d   : > { %4177 = vst [vmem:[%s6043_s17 + $0x68] sm:$0xff] %v4122_v58 }
 0x61e   : > { %4178 = vst [vmem:[%s6043_s17 + $0x70] sm:$0xff] %v4124_v50  ;;  %v4127_v43 = vpop.f32.mrb[62].mxu1 }
 0x61f   : > { %v4128_v16 = vadd.f32 %v4127_v43, %v4036_v40  ;;  %v4129_v4 = vpop.f32.mrb[63].mxu1 }
 0x620   : > { %v4130_v42 = vadd.f32 %v4129_v4, %v4040_v6 }
 0x621   : > { %4182 = vst [vmem:[%s6043_s17 + $0x90] sm:$0xff] %v4128_v16 }
 0x622   : > { %4183 = vst [vmem:[%s6043_s17 + $0x98] sm:$0xff] %v4130_v42  ;;  %v4133_v49 = vpop.f32.mrb[64].mxu1 }
 0x623   : > { %v4134_v13 = vadd.f32 %v4133_v49, %v4036_v40  ;;  %v4135_v25 = vpop.f32.mrb[65].mxu1 }
 0x624   : > { %v4136_v59 = vadd.f32 %v4135_v25, %v4040_v6 }
 0x625   : > { %4187 = vst [vmem:[%s6043_s17 + $0xb8] sm:$0xff] %v4134_v13 }
 0x626   : > { %4188 = vst [vmem:[%s6043_s17 + $0xc0] sm:$0xff] %v4136_v59 }
 0x627   : > { %v4139_v34 = vpop.f32.mrb[66].mxu1 }
 0x628   : > { %v4140_v9 = vadd.f32 %v4139_v34, %v4036_v40  ;;  %v4141_v62 = vpop.f32.mrb[67].mxu1 }
 0x629   : > { %v4142_v12 = vadd.f32 %v4141_v62, %v4040_v6 }
 0x62a   : > { %4192 = vst [vmem:[%s6043_s17 + $0xe0] sm:$0xff] %v4140_v9 }
 0x62b   : > { %4193 = vst [vmem:[%s6043_s17 + $0xe8] sm:$0xff] %v4142_v12 }
 0x62c   : > { %v4145_v37 = vpop.f32.mrb[68].mxu1 }
 0x62d   : > { %v4146_v20 = vadd.f32 %v4145_v37, %v4036_v40  ;;  %v4147_v23 = vpop.f32.mrb[69].mxu1 }
 0x62e   : > { %v4148_v44 = vadd.f32 %v4147_v23, %v4040_v6 }
 0x62f   : > { %4197 = vst [vmem:[%s6043_s17 + $0x108] sm:$0xff] %v4146_v20 }
 0x630   : > { %4198 = vst [vmem:[%s6043_s17 + $0x110] sm:$0xff] %v4148_v44 }
 0x631   : > { %v4151_v46 = vpop.f32.mrb[70].mxu1 }
 0x632   : > { %v4152_v57 = vadd.f32 %v4151_v46, %v4036_v40  ;;  %v4153_v3 = vpop.f32.mrb[71].mxu1 }
 0x633   : > { %v4154_v38 = vadd.f32 %v4153_v3, %v4040_v6 }
 0x634   : > { %4202 = vst [vmem:[%s6043_s17 + $0x130] sm:$0xff] %v4152_v57 }
 0x635   : > { %4203 = vst [vmem:[%s6043_s17 + $0x138] sm:$0xff] %v4154_v38 }
 0x636 PF: > { %p27_p10 = scmp.ge.s32.totalorder %s5583_s11, 4   ;;  %s6474_s21 = smov %s5352_s22 }
 0x637   : > { %s6475_s22 = smov %s5356_s23  ;;  %s6476_s23 = smov %s5592_s13 }
 0x638   : > { %s6477_s24 = smov %s5583_s11  ;;  %29 = sbr.rel (!%p27_p10) target bundleno = 16 (0x10), region = 137 }
 0x63f   :  { %4228 = vsyncpa [#allocation3], 1 }
 0x640   :  { %4230 = vsyncpa [#allocation3 + $0x1], 1 }
 0x641   :  { %4231 = vsyncpa [#allocation5], 1 }
 0x642   :  { %4233 = vsyncpa [#allocation5 + $0x1], 1 }
 0x643   :  { %4234 = vsyncpa [#allocation8], 1 }
 0x644   :  { %4235 = vsyncpa [#allocation11], 1 }

</bundles_post_ra>
